<compile_context>
chip_gen: v5e
topology: v5e:2x2
jax: 0.10.0
libtpu: 0.0.40
codegen_flags: <defaults>
</compile_context>

<pallas_src>
import functools

import jax
import jax.numpy as jnp
from jax.experimental import pallas as pl
from jax.experimental.pallas import tpu as pltpu


# ------------------------------ helpers ------------------------------------ #

def _row_tile(n, target=512):
    """Largest row tile <= target that divides n (multiple of 8 when tiling).

    v5e/v6e: target=512 sits near the HBM roofline; on v7x (64 MiB VMEM per TC)
    pass target=256 to leave room for double-buffered inputs.
    """
    if n <= target:
        return n
    for t in range(target, 0, -1):
        if n % t == 0 and t % 8 == 0:
            return t
    return n


# ------------------------------ kernels ------------------------------------ #

def _qkv_kernel(x_ref, w_ref, b_ref, o_ref):
    # x: (tm, C), w: (C, 3C) packed [Wq^T | Wk^T | Wv^T], b: (1, 3C)
    y = jnp.dot(x_ref[...], w_ref[...], preferred_element_type=jnp.float32)
    o_ref[...] = (y + b_ref[...]).astype(o_ref.dtype)


def _mha_kernel(q_ref, k_ref, v_ref, o_ref, *, scale, num_heads):
    # Refs are (T, H, Dh): one batch element per grid step, all heads packed
    # (amortizes per-step overhead and keeps the HBM store lane-dense: the
    # per-step output is T contiguous rows of C = H*Dh values).
    q = q_ref[...].astype(jnp.float32) * scale
    k = k_ref[...].astype(jnp.float32)
    v = v_ref[...]
    for h in range(num_heads):                       # static unroll over heads
        qh, kh, vh = q[:, h, :], k[:, h, :], v[:, h, :]
        # q @ k^T expressed as a contraction over the last dims (no explicit k.T).
        s = jax.lax.dot_general(qh, kh, (((1,), (1,)), ((), ())),
                                preferred_element_type=jnp.float32)   # (T, T)
        m = jnp.max(s, axis=-1, keepdims=True)
        p = jnp.exp(s - m)
        l = jnp.sum(p, axis=-1, keepdims=True)
        p = p * pl.reciprocal(l, approx=True)        # EUP vrcp: ~free slot
        o = jnp.dot(p.astype(vh.dtype), vh, preferred_element_type=jnp.float32)
        o_ref[:, h, :] = o.astype(o_ref.dtype)
    # NOTE: for long sequences this should become a flash-style KV-tiled grid
    # (online softmax with VMEM scratch) so the (T, T) score tile is never
    # materialized; at moderate T the single-tile form is fine.


def _proj_add_ln_kernel(a_ref, w_ref, b_ref, res_ref, g_ref, beta_ref, o_ref, *, eps):
    # out-projection + residual add + LayerNorm, fused into the matmul epilogue
    y = jnp.dot(a_ref[...], w_ref[...], preferred_element_type=jnp.float32)
    y = y + b_ref[...] + res_ref[...].astype(jnp.float32)
    mu = jnp.mean(y, axis=-1, keepdims=True)
    yc = y - mu
    var = jnp.mean(yc * yc, axis=-1, keepdims=True)
    yn = yc * jax.lax.rsqrt(var + eps)
    o_ref[...] = (yn * g_ref[...] + beta_ref[...]).astype(o_ref.dtype)


def _ffn_ln_kernel(x_ref, w1_ref, b1_ref, w2_ref, b2_ref, g_ref, beta_ref, o_ref, *, eps):
    # fc1 + ReLU + fc2 + residual + LayerNorm; the (tm, FFN) hidden activation
    # stays in VMEM/vregs and never makes an HBM round trip.
    x = x_ref[...]
    h = jnp.dot(x, w1_ref[...], preferred_element_type=jnp.float32) + b1_ref[...]
    h = jnp.maximum(h, 0.0)
    y = jnp.dot(h.astype(x.dtype), w2_ref[...], preferred_element_type=jnp.float32)
    y = y + b2_ref[...] + x.astype(jnp.float32)
    mu = jnp.mean(y, axis=-1, keepdims=True)
    yc = y - mu
    var = jnp.mean(yc * yc, axis=-1, keepdims=True)
    o_ref[...] = (yc * jax.lax.rsqrt(var + eps) * g_ref[...]
                  + beta_ref[...]).astype(o_ref.dtype)


# --------------------------- parameter packing ------------------------------ #

def pack_params(raw):
    """One-time parameter packing (run once, outside the jitted forward):
    - Q/K/V weights concatenated into a single (C, 3C) matrix, biases -> (1, 3C)
    - all weights pre-transposed to (Din, Dout) so no w.T runs per forward
    - biases / LayerNorm affine params reshaped to (1, D) row vectors
    """
    c = raw["wq"].shape[0]
    return {
        "wqkv": jnp.concatenate([raw["wq"].T, raw["wk"].T, raw["wv"].T], axis=1),
        "bqkv": jnp.concatenate([raw["bq"], raw["bk"], raw["bv"]]).reshape(1, 3 * c),
        "wo_t": raw["wo"].T,
        "bo": raw["bo"].reshape(1, c),
        "w1_t": raw["w_fc1"].T,
        "b1": raw["b_fc1"].reshape(1, -1),
        "w2_t": raw["w_fc2"].T,
        "b2": raw["b_fc2"].reshape(1, c),
        "ln1_g": raw["ln1_g"].reshape(1, c),
        "ln1_b": raw["ln1_b"].reshape(1, c),
        "ln2_g": raw["ln2_g"].reshape(1, c),
        "ln2_b": raw["ln2_b"].reshape(1, c),
    }


# ------------------------------ layer wrapper -------------------------------- #

def transformer_sentence_encoder_layer(x, params, *, num_heads):
    """Forward of TransformerSentenceEncoderLayer (normalize_before=False, eval).

    x: (T, B, C) -> (T, B, C).  `params` is the output of pack_params().
    """
    t, b, c = x.shape
    h = num_heads
    dh = c // h
    n = t * b
    ffn = params["w1_t"].shape[1]
    tm = _row_tile(n)
    cp = pltpu.CompilerParams(dimension_semantics=("parallel",))

    x2d = x.reshape(n, c)                       # free reshape

    # ---- 1. fused QKV projection: (N, C) @ (C, 3C) ----
    qkv = pl.pallas_call(
        _qkv_kernel,
        out_shape=jax.ShapeDtypeStruct((n, 3 * c), x.dtype),
        grid=(n // tm,),
        in_specs=[
            pl.BlockSpec((tm, c), lambda i: (i, 0)),
            pl.BlockSpec((c, 3 * c), lambda i: (0, 0)),   # weight resident across grid
            pl.BlockSpec((1, 3 * c), lambda i: (0, 0)),
        ],
        out_specs=pl.BlockSpec((tm, 3 * c), lambda i: (i, 0)),
        compiler_params=cp,
    )(x2d, params["wqkv"], params["bqkv"])

    # Free (bitcast) reshape: (N, 3C) -> (T, B, 3, H, Dh).  The attention
    # BlockSpecs pick q/k/v and the batch element straight out of this packed
    # tensor, so no HBM transpose / slice ops run between the kernels.
    qkv5 = qkv.reshape(t, b, 3, h, dh)

    # ---- 2. multi-head self-attention (grid over batch, all heads per step) ----
    attn = pl.pallas_call(
        functools.partial(_mha_kernel, scale=dh ** -0.5, num_heads=h),
        out_shape=jax.ShapeDtypeStruct((t, b, h, dh), x.dtype),
        grid=(b,),
        in_specs=[
            pl.BlockSpec((t, None, None, h, dh), lambda i: (0, i, 0, 0, 0)),  # Q
            pl.BlockSpec((t, None, None, h, dh), lambda i: (0, i, 1, 0, 0)),  # K
            pl.BlockSpec((t, None, None, h, dh), lambda i: (0, i, 2, 0, 0)),  # V
        ],
        out_specs=pl.BlockSpec((t, None, h, dh), lambda i: (0, i, 0, 0)),
        compiler_params=cp,
    )(qkv5, qkv5, qkv5)

    attn2d = attn.reshape(n, c)                 # free reshape (fairseq head merge)

    # ---- 3. out-projection + residual + self_attn_layer_norm ----
    x1 = pl.pallas_call(
        functools.partial(_proj_add_ln_kernel, eps=1e-5),
        out_shape=jax.ShapeDtypeStruct((n, c), x.dtype),
        grid=(n // tm,),
        in_specs=[
            pl.BlockSpec((tm, c), lambda i: (i, 0)),      # attention output
            pl.BlockSpec((c, c), lambda i: (0, 0)),       # Wo^T (resident)
            pl.BlockSpec((1, c), lambda i: (0, 0)),       # bo
            pl.BlockSpec((tm, c), lambda i: (i, 0)),      # residual (= x)
            pl.BlockSpec((1, c), lambda i: (0, 0)),       # gamma
            pl.BlockSpec((1, c), lambda i: (0, 0)),       # beta
        ],
        out_specs=pl.BlockSpec((tm, c), lambda i: (i, 0)),
        compiler_params=cp,
    )(attn2d, params["wo_t"], params["bo"], x2d, params["ln1_g"], params["ln1_b"])

    # ---- 4. fused FFN: fc1 + ReLU + fc2 + residual + final_layer_norm ----
    out2d = pl.pallas_call(
        functools.partial(_ffn_ln_kernel, eps=1e-5),
        out_shape=jax.ShapeDtypeStruct((n, c), x.dtype),
        grid=(n // tm,),
        in_specs=[
            pl.BlockSpec((tm, c), lambda i: (i, 0)),      # x1 (also the residual)
            pl.BlockSpec((c, ffn), lambda i: (0, 0)),     # W1^T (resident)
            pl.BlockSpec((1, ffn), lambda i: (0, 0)),     # b1
            pl.BlockSpec((ffn, c), lambda i: (0, 0)),     # W2^T (resident)
            pl.BlockSpec((1, c), lambda i: (0, 0)),       # b2
            pl.BlockSpec((1, c), lambda i: (0, 0)),       # gamma
            pl.BlockSpec((1, c), lambda i: (0, 0)),       # beta
        ],
        out_specs=pl.BlockSpec((tm, c), lambda i: (i, 0)),
        compiler_params=cp,
    )(x1, params["w1_t"], params["b1"], params["w2_t"], params["b2"],
      params["ln2_g"], params["ln2_b"])

    return out2d.reshape(t, b, c)


# --------------------------- pure-JAX reference ------------------------------ #

def reference_forward(x, raw, *, num_heads):
    t, b, c = x.shape
    dh = c // num_heads
    x2d = x.reshape(t * b, c)

    def lin(a, w, bb):
        return a @ w.T + bb

    q = lin(x2d, raw["wq"], raw["bq"]) * (dh ** -0.5)
    k = lin(x2d, raw["wk"], raw["bk"])
    v = lin(x2d, raw["wv"], raw["bv"])
    qh = q.reshape(t, b * num_heads, dh).transpose(1, 0, 2)
    kh = k.reshape(t, b * num_heads, dh).transpose(1, 0, 2)
    vh = v.reshape(t, b * num_heads, dh).transpose(1, 0, 2)
    s = jnp.einsum("bqd,bkd->bqk", qh, kh)
    p = jax.nn.softmax(s, axis=-1)
    a = jnp.einsum("bqk,bkd->bqd", p, vh)
    a = a.transpose(1, 0, 2).reshape(t * b, c)
    a = lin(a, raw["wo"], raw["bo"])

    def ln(z, g, bb):
        mu = z.mean(-1, keepdims=True)
        var = ((z - mu) ** 2).mean(-1, keepdims=True)
        return (z - mu) * jax.lax.rsqrt(var + 1e-5) * g + bb

    x1 = ln(x2d + a, raw["ln1_g"], raw["ln1_b"])
    hh = jnp.maximum(lin(x1, raw["w_fc1"], raw["b_fc1"]), 0.0)
    hh = lin(hh, raw["w_fc2"], raw["b_fc2"])
    out = ln(x1 + hh, raw["ln2_g"], raw["ln2_b"])
    return out.reshape(t, b, c)


# ----------------------------------- main ------------------------------------ #

if __name__ == "__main__":
    # Small shapes consistent with the module (scaled-down BERT layer).
    T, B, C = 8, 2, 32            # seq, batch, embedding_dim
    FFN = 64                      # ffn_embedding_dim
    H = 4                         # num_attention_heads (C % H == 0)

    key = jax.random.PRNGKey(0)
    ks = jax.random.split(key, 13)
    s = 0.05
    raw = {
        "wq": s * jax.random.normal(ks[0], (C, C), jnp.float32),
        "bq": s * jax.random.normal(ks[1], (C,), jnp.float32),
        "wk": s * jax.random.normal(ks[2], (C, C), jnp.float32),
        "bk": s * jax.random.normal(ks[3], (C,), jnp.float32),
        "wv": s * jax.random.normal(ks[4], (C, C), jnp.float32),
        "bv": s * jax.random.normal(ks[5], (C,), jnp.float32),
        "wo": s * jax.random.normal(ks[6], (C, C), jnp.float32),
        "bo": s * jax.random.normal(ks[7], (C,), jnp.float32),
        "w_fc1": s * jax.random.normal(ks[8], (FFN, C), jnp.float32),
        "b_fc1": s * jax.random.normal(ks[9], (FFN,), jnp.float32),
        "w_fc2": s * jax.random.normal(ks[10], (C, FFN), jnp.float32),
        "b_fc2": s * jax.random.normal(ks[11], (C,), jnp.float32),
        "ln1_g": jnp.ones((C,), jnp.float32),
        "ln1_b": jnp.zeros((C,), jnp.float32),
        "ln2_g": jnp.ones((C,), jnp.float32),
        "ln2_b": jnp.zeros((C,), jnp.float32),
    }
    x = jax.random.normal(ks[12], (T, B, C), jnp.float32)

    params = pack_params(raw)     # one-time packing; no per-forward transposes

    fwd = jax.jit(functools.partial(transformer_sentence_encoder_layer,
                                    num_heads=H))
    out = jax.block_until_ready(fwd(x, params))

    ref = reference_forward(x, raw, num_heads=H)
    assert out.shape == (T, B, C)
    # 2e-3 tolerance: the softmax denominator uses the approximate EUP reciprocal.
    err = float(jnp.max(jnp.abs(out - ref)))
    assert jnp.allclose(out, ref, rtol=2e-3, atol=2e-3), f"mismatch vs reference ({err})"

    print("KERNEL_OK")
</pallas_src>

<mosaic_0001>
module attributes {stable_mosaic.version = 11 : i64} {
  func.func @_qkv_kernel(%arg0: i32, %arg1: memref<16x32xf32, #tpu.memory_space<vmem>>, %arg2: memref<32x96xf32, #tpu.memory_space<vmem>>, %arg3: memref<1x96xf32, #tpu.memory_space<vmem>>, %arg4: memref<16x96xf32, #tpu.memory_space<vmem>>) attributes {dimension_semantics = [#tpu.dimension_semantics<parallel>], iteration_bounds = array<i64: 1>, scalar_prefetch = 0 : i64, scratch_operands = 0 : i64, tpu.core_type = #tpu.core_type<tc>, window_params = [{transform_indices = @transform_0, window_bounds = array<i64: 16, 32>}, {pipeline_mode = #tpu.pipeline_mode<synchronous>, transform_indices = @transform_1, window_bounds = array<i64: 32, 96>}, {pipeline_mode = #tpu.pipeline_mode<synchronous>, transform_indices = @transform_2, window_bounds = array<i64: 1, 96>}, {transform_indices = @transform_3, window_bounds = array<i64: 16, 96>}]} {
    %c0 = arith.constant 0 : index
    %c0_0 = arith.constant 0 : index
    %0 = vector.load %arg1[%c0, %c0_0] : memref<16x32xf32, #tpu.memory_space<vmem>>, vector<16x32xf32>
    %c0_1 = arith.constant 0 : index
    %c0_2 = arith.constant 0 : index
    %1 = vector.load %arg2[%c0_1, %c0_2] : memref<32x96xf32, #tpu.memory_space<vmem>>, vector<32x96xf32>
    %cst = arith.constant dense<0.000000e+00> : vector<16x96xf32>
    %2 = tpu.matmul %0, %1, %cst {dimension_numbers = #tpu.dot_dimension_numbers<[1], [0], [0], [1], [0, 0, 1, 1], [], []>} : vector<16x32xf32>, vector<32x96xf32>, vector<16x96xf32> -> vector<16x96xf32>
    %c0_3 = arith.constant 0 : index
    %c0_4 = arith.constant 0 : index
    %3 = vector.load %arg3[%c0_3, %c0_4] : memref<1x96xf32, #tpu.memory_space<vmem>>, vector<1x96xf32>
    %4 = vector.broadcast %3 : vector<1x96xf32> to vector<16x96xf32>
    %5 = arith.addf %2, %4 : vector<16x96xf32>
    %c0_5 = arith.constant 0 : index
    %c0_6 = arith.constant 0 : index
    %6 = vector.load %arg4[%c0_5, %c0_6] : memref<16x96xf32, #tpu.memory_space<vmem>>, vector<16x96xf32>
    tpu.vector_store %arg4[%c0_5, %c0_6], %5 {strides = array<i32>} : memref<16x96xf32, #tpu.memory_space<vmem>>, vector<16x96xf32>,
    return
  }
  func.func @transform_0(%arg0: i32) -> (i32, i32) {
    %c0_i32 = arith.constant 0 : i32
    %c0_i32_0 = arith.constant 0 : i32
    return %arg0, %c0_i32 : i32, i32
  }
  func.func @transform_1(%arg0: i32) -> (i32, i32) {
    %c0_i32 = arith.constant 0 : i32
    %c0_i32_0 = arith.constant 0 : i32
    %c0_i32_1 = arith.constant 0 : i32
    return %c0_i32, %c0_i32_0 : i32, i32
  }
  func.func @transform_2(%arg0: i32) -> (i32, i32) {
    %c0_i32 = arith.constant 0 : i32
    %c0_i32_0 = arith.constant 0 : i32
    %c0_i32_1 = arith.constant 0 : i32
    return %c0_i32, %c0_i32_0 : i32, i32
  }
  func.func @transform_3(%arg0: i32) -> (i32, i32) {
    %c0_i32 = arith.constant 0 : i32
    %c0_i32_0 = arith.constant 0 : i32
    return %arg0, %c0_i32 : i32, i32
  }
}

module attributes {stable_mosaic.version = 11 : i64} {
  func.func @_mha_kernel(%arg0: i32, %arg1: memref<8x1x1x4x8xf32, #tpu.memory_space<vmem>>, %arg2: memref<8x1x1x4x8xf32, #tpu.memory_space<vmem>>, %arg3: memref<8x1x1x4x8xf32, #tpu.memory_space<vmem>>, %arg4: memref<8x1x4x8xf32, #tpu.memory_space<vmem>>) attributes {dimension_semantics = [#tpu.dimension_semantics<parallel>], iteration_bounds = array<i64: 2>, scalar_prefetch = 0 : i64, scratch_operands = 0 : i64, tpu.core_type = #tpu.core_type<tc>, window_params = [{transform_indices = @transform_0, window_bounds = array<i64: 8, 1, 1, 4, 8>}, {transform_indices = @transform_1, window_bounds = array<i64: 8, 1, 1, 4, 8>}, {transform_indices = @transform_2, window_bounds = array<i64: 8, 1, 1, 4, 8>}, {transform_indices = @transform_3, window_bounds = array<i64: 8, 1, 4, 8>}]} {
    %c0 = arith.constant 0 : index
    %c0_0 = arith.constant 0 : index
    %c0_1 = arith.constant 0 : index
    %c0_2 = arith.constant 0 : index
    %c0_3 = arith.constant 0 : index
    %0 = vector.load %arg1[%c0, %c0_0, %c0_1, %c0_2, %c0_3] : memref<8x1x1x4x8xf32, #tpu.memory_space<vmem>>, vector<8x1x1x4x8xf32>
    %1 = vector.shape_cast %0 : vector<8x1x1x4x8xf32> to vector<8x4x8xf32>
    %cst = arith.constant 0.353553385 : f32
    %2 = vector.broadcast %cst : f32 to vector<8x4x8xf32>
    %3 = arith.mulf %1, %2 : vector<8x4x8xf32>
    %c0_4 = arith.constant 0 : index
    %c0_5 = arith.constant 0 : index
    %c0_6 = arith.constant 0 : index
    %c0_7 = arith.constant 0 : index
    %c0_8 = arith.constant 0 : index
    %4 = vector.load %arg2[%c0_4, %c0_5, %c0_6, %c0_7, %c0_8] : memref<8x1x1x4x8xf32, #tpu.memory_space<vmem>>, vector<8x1x1x4x8xf32>
    %5 = vector.shape_cast %4 : vector<8x1x1x4x8xf32> to vector<8x4x8xf32>
    %c0_9 = arith.constant 0 : index
    %c0_10 = arith.constant 0 : index
    %c0_11 = arith.constant 0 : index
    %c0_12 = arith.constant 0 : index
    %c0_13 = arith.constant 0 : index
    %6 = vector.load %arg3[%c0_9, %c0_10, %c0_11, %c0_12, %c0_13] : memref<8x1x1x4x8xf32, #tpu.memory_space<vmem>>, vector<8x1x1x4x8xf32>
    %7 = vector.shape_cast %6 : vector<8x1x1x4x8xf32> to vector<8x4x8xf32>
    %8 = vector.extract_strided_slice %3 {offsets = [0, 0, 0], sizes = [8, 1, 8], strides = [1, 1, 1]} : vector<8x4x8xf32> to vector<8x1x8xf32>
    %9 = vector.shape_cast %8 : vector<8x1x8xf32> to vector<8x8xf32>
    %10 = vector.extract_strided_slice %5 {offsets = [0, 0, 0], sizes = [8, 1, 8], strides = [1, 1, 1]} : vector<8x4x8xf32> to vector<8x1x8xf32>
    %11 = vector.shape_cast %10 : vector<8x1x8xf32> to vector<8x8xf32>
    %12 = vector.extract_strided_slice %7 {offsets = [0, 0, 0], sizes = [8, 1, 8], strides = [1, 1, 1]} : vector<8x4x8xf32> to vector<8x1x8xf32>
    %13 = vector.shape_cast %12 : vector<8x1x8xf32> to vector<8x8xf32>
    %cst_14 = arith.constant dense<0.000000e+00> : vector<8x8xf32>
    %14 = tpu.matmul %9, %11, %cst_14 {dimension_numbers = #tpu.dot_dimension_numbers<[1], [1], [0], [0], [0, 0, 1, 0], [], []>} : vector<8x8xf32>, vector<8x8xf32>, vector<8x8xf32> -> vector<8x8xf32>
    %cst_15 = arith.constant dense<0xFF800000> : vector<8xf32>
    %15 = vector.multi_reduction <maximumf>, %14, %cst_15 [1] : vector<8x8xf32> to vector<8xf32>
    %16 = vector.shape_cast %15 : vector<8xf32> to vector<8x1xf32>
    %17 = vector.broadcast %16 : vector<8x1xf32> to vector<8x8xf32>
    %18 = arith.subf %14, %17 : vector<8x8xf32>
    %19 = math.exp %18 : vector<8x8xf32>
    %cst_16 = arith.constant dense<0.000000e+00> : vector<8xf32>
    %20 = vector.multi_reduction <add>, %19, %cst_16 [1] : vector<8x8xf32> to vector<8xf32>
    %21 = vector.shape_cast %20 : vector<8xf32> to vector<8x1xf32>
    %22 = tpu.reciprocal %21 {approx = true} : vector<8x1xf32> -> vector<8x1xf32>
    %23 = vector.broadcast %22 : vector<8x1xf32> to vector<8x8xf32>
    %24 = arith.mulf %19, %23 : vector<8x8xf32>
    %cst_17 = arith.constant dense<0.000000e+00> : vector<8x8xf32>
    %25 = tpu.matmul %24, %13, %cst_17 {dimension_numbers = #tpu.dot_dimension_numbers<[1], [0], [0], [1], [0, 0, 1, 1], [], []>} : vector<8x8xf32>, vector<8x8xf32>, vector<8x8xf32> -> vector<8x8xf32>
    %c0_18 = arith.constant 0 : index
    %c0_19 = arith.constant 0 : index
    %c0_20 = arith.constant 0 : index
    %c0_21 = arith.constant 0 : index
    %26 = vector.load %arg4[%c0_18, %c0_19, %c0_20, %c0_21] : memref<8x1x4x8xf32, #tpu.memory_space<vmem>>, vector<8x1x1x8xf32>
    %27 = vector.shape_cast %26 : vector<8x1x1x8xf32> to vector<8x8xf32>
    %28 = vector.shape_cast %25 : vector<8x8xf32> to vector<8x1x1x8xf32>
    tpu.vector_store %arg4[%c0_18, %c0_19, %c0_20, %c0_21], %28 {strides = array<i32>} : memref<8x1x4x8xf32, #tpu.memory_space<vmem>>, vector<8x1x1x8xf32>,
    %29 = vector.extract_strided_slice %3 {offsets = [0, 1, 0], sizes = [8, 1, 8], strides = [1, 1, 1]} : vector<8x4x8xf32> to vector<8x1x8xf32>
    %30 = vector.shape_cast %29 : vector<8x1x8xf32> to vector<8x8xf32>
    %31 = vector.extract_strided_slice %5 {offsets = [0, 1, 0], sizes = [8, 1, 8], strides = [1, 1, 1]} : vector<8x4x8xf32> to vector<8x1x8xf32>
    %32 = vector.shape_cast %31 : vector<8x1x8xf32> to vector<8x8xf32>
    %33 = vector.extract_strided_slice %7 {offsets = [0, 1, 0], sizes = [8, 1, 8], strides = [1, 1, 1]} : vector<8x4x8xf32> to vector<8x1x8xf32>
    %34 = vector.shape_cast %33 : vector<8x1x8xf32> to vector<8x8xf32>
    %cst_22 = arith.constant dense<0.000000e+00> : vector<8x8xf32>
    %35 = tpu.matmul %30, %32, %cst_22 {dimension_numbers = #tpu.dot_dimension_numbers<[1], [1], [0], [0], [0, 0, 1, 0], [], []>} : vector<8x8xf32>, vector<8x8xf32>, vector<8x8xf32> -> vector<8x8xf32>
    %cst_23 = arith.constant dense<0xFF800000> : vector<8xf32>
    %36 = vector.multi_reduction <maximumf>, %35, %cst_23 [1] : vector<8x8xf32> to vector<8xf32>
    %37 = vector.shape_cast %36 : vector<8xf32> to vector<8x1xf32>
    %38 = vector.broadcast %37 : vector<8x1xf32> to vector<8x8xf32>
    %39 = arith.subf %35, %38 : vector<8x8xf32>
    %40 = math.exp %39 : vector<8x8xf32>
    %cst_24 = arith.constant dense<0.000000e+00> : vector<8xf32>
    %41 = vector.multi_reduction <add>, %40, %cst_24 [1] : vector<8x8xf32> to vector<8xf32>
    %42 = vector.shape_cast %41 : vector<8xf32> to vector<8x1xf32>
    %43 = tpu.reciprocal %42 {approx = true} : vector<8x1xf32> -> vector<8x1xf32>
    %44 = vector.broadcast %43 : vector<8x1xf32> to vector<8x8xf32>
    %45 = arith.mulf %40, %44 : vector<8x8xf32>
    %cst_25 = arith.constant dense<0.000000e+00> : vector<8x8xf32>
    %46 = tpu.matmul %45, %34, %cst_25 {dimension_numbers = #tpu.dot_dimension_numbers<[1], [0], [0], [1], [0, 0, 1, 1], [], []>} : vector<8x8xf32>, vector<8x8xf32>, vector<8x8xf32> -> vector<8x8xf32>
    %c0_26 = arith.constant 0 : index
    %c0_27 = arith.constant 0 : index
    %c1 = arith.constant 1 : index
    %c0_28 = arith.constant 0 : index
    %47 = vector.load %arg4[%c0_26, %c0_27, %c1, %c0_28] : memref<8x1x4x8xf32, #tpu.memory_space<vmem>>, vector<8x1x1x8xf32>
    %48 = vector.shape_cast %47 : vector<8x1x1x8xf32> to vector<8x8xf32>
    %49 = vector.shape_cast %46 : vector<8x8xf32> to vector<8x1x1x8xf32>
    tpu.vector_store %arg4[%c0_26, %c0_27, %c1, %c0_28], %49 {strides = array<i32>} : memref<8x1x4x8xf32, #tpu.memory_space<vmem>>, vector<8x1x1x8xf32>,
    %50 = vector.extract_strided_slice %3 {offsets = [0, 2, 0], sizes = [8, 1, 8], strides = [1, 1, 1]} : vector<8x4x8xf32> to vector<8x1x8xf32>
    %51 = vector.shape_cast %50 : vector<8x1x8xf32> to vector<8x8xf32>
    %52 = vector.extract_strided_slice %5 {offsets = [0, 2, 0], sizes = [8, 1, 8], strides = [1, 1, 1]} : vector<8x4x8xf32> to vector<8x1x8xf32>
    %53 = vector.shape_cast %52 : vector<8x1x8xf32> to vector<8x8xf32>
    %54 = vector.extract_strided_slice %7 {offsets = [0, 2, 0], sizes = [8, 1, 8], strides = [1, 1, 1]} : vector<8x4x8xf32> to vector<8x1x8xf32>
    %55 = vector.shape_cast %54 : vector<8x1x8xf32> to vector<8x8xf32>
    %cst_29 = arith.constant dense<0.000000e+00> : vector<8x8xf32>
    %56 = tpu.matmul %51, %53, %cst_29 {dimension_numbers = #tpu.dot_dimension_numbers<[1], [1], [0], [0], [0, 0, 1, 0], [], []>} : vector<8x8xf32>, vector<8x8xf32>, vector<8x8xf32> -> vector<8x8xf32>
    %cst_30 = arith.constant dense<0xFF800000> : vector<8xf32>
    %57 = vector.multi_reduction <maximumf>, %56, %cst_30 [1] : vector<8x8xf32> to vector<8xf32>
    %58 = vector.shape_cast %57 : vector<8xf32> to vector<8x1xf32>
    %59 = vector.broadcast %58 : vector<8x1xf32> to vector<8x8xf32>
    %60 = arith.subf %56, %59 : vector<8x8xf32>
    %61 = math.exp %60 : vector<8x8xf32>
    %cst_31 = arith.constant dense<0.000000e+00> : vector<8xf32>
    %62 = vector.multi_reduction <add>, %61, %cst_31 [1] : vector<8x8xf32> to vector<8xf32>
    %63 = vector.shape_cast %62 : vector<8xf32> to vector<8x1xf32>
    %64 = tpu.reciprocal %63 {approx = true} : vector<8x1xf32> -> vector<8x1xf32>
    %65 = vector.broadcast %64 : vector<8x1xf32> to vector<8x8xf32>
    %66 = arith.mulf %61, %65 : vector<8x8xf32>
    %cst_32 = arith.constant dense<0.000000e+00> : vector<8x8xf32>
    %67 = tpu.matmul %66, %55, %cst_32 {dimension_numbers = #tpu.dot_dimension_numbers<[1], [0], [0], [1], [0, 0, 1, 1], [], []>} : vector<8x8xf32>, vector<8x8xf32>, vector<8x8xf32> -> vector<8x8xf32>
    %c0_33 = arith.constant 0 : index
    %c0_34 = arith.constant 0 : index
    %c2 = arith.constant 2 : index
    %c0_35 = arith.constant 0 : index
    %68 = vector.load %arg4[%c0_33, %c0_34, %c2, %c0_35] : memref<8x1x4x8xf32, #tpu.memory_space<vmem>>, vector<8x1x1x8xf32>
    %69 = vector.shape_cast %68 : vector<8x1x1x8xf32> to vector<8x8xf32>
    %70 = vector.shape_cast %67 : vector<8x8xf32> to vector<8x1x1x8xf32>
    tpu.vector_store %arg4[%c0_33, %c0_34, %c2, %c0_35], %70 {strides = array<i32>} : memref<8x1x4x8xf32, #tpu.memory_space<vmem>>, vector<8x1x1x8xf32>,
    %71 = vector.extract_strided_slice %3 {offsets = [0, 3, 0], sizes = [8, 1, 8], strides = [1, 1, 1]} : vector<8x4x8xf32> to vector<8x1x8xf32>
    %72 = vector.shape_cast %71 : vector<8x1x8xf32> to vector<8x8xf32>
    %73 = vector.extract_strided_slice %5 {offsets = [0, 3, 0], sizes = [8, 1, 8], strides = [1, 1, 1]} : vector<8x4x8xf32> to vector<8x1x8xf32>
    %74 = vector.shape_cast %73 : vector<8x1x8xf32> to vector<8x8xf32>
    %75 = vector.extract_strided_slice %7 {offsets = [0, 3, 0], sizes = [8, 1, 8], strides = [1, 1, 1]} : vector<8x4x8xf32> to vector<8x1x8xf32>
    %76 = vector.shape_cast %75 : vector<8x1x8xf32> to vector<8x8xf32>
    %cst_36 = arith.constant dense<0.000000e+00> : vector<8x8xf32>
    %77 = tpu.matmul %72, %74, %cst_36 {dimension_numbers = #tpu.dot_dimension_numbers<[1], [1], [0], [0], [0, 0, 1, 0], [], []>} : vector<8x8xf32>, vector<8x8xf32>, vector<8x8xf32> -> vector<8x8xf32>
    %cst_37 = arith.constant dense<0xFF800000> : vector<8xf32>
    %78 = vector.multi_reduction <maximumf>, %77, %cst_37 [1] : vector<8x8xf32> to vector<8xf32>
    %79 = vector.shape_cast %78 : vector<8xf32> to vector<8x1xf32>
    %80 = vector.broadcast %79 : vector<8x1xf32> to vector<8x8xf32>
    %81 = arith.subf %77, %80 : vector<8x8xf32>
    %82 = math.exp %81 : vector<8x8xf32>
    %cst_38 = arith.constant dense<0.000000e+00> : vector<8xf32>
    %83 = vector.multi_reduction <add>, %82, %cst_38 [1] : vector<8x8xf32> to vector<8xf32>
    %84 = vector.shape_cast %83 : vector<8xf32> to vector<8x1xf32>
    %85 = tpu.reciprocal %84 {approx = true} : vector<8x1xf32> -> vector<8x1xf32>
    %86 = vector.broadcast %85 : vector<8x1xf32> to vector<8x8xf32>
    %87 = arith.mulf %82, %86 : vector<8x8xf32>
    %cst_39 = arith.constant dense<0.000000e+00> : vector<8x8xf32>
    %88 = tpu.matmul %87, %76, %cst_39 {dimension_numbers = #tpu.dot_dimension_numbers<[1], [0], [0], [1], [0, 0, 1, 1], [], []>} : vector<8x8xf32>, vector<8x8xf32>, vector<8x8xf32> -> vector<8x8xf32>
    %c0_40 = arith.constant 0 : index
    %c0_41 = arith.constant 0 : index
    %c3 = arith.constant 3 : index
    %c0_42 = arith.constant 0 : index
    %89 = vector.load %arg4[%c0_40, %c0_41, %c3, %c0_42] : memref<8x1x4x8xf32, #tpu.memory_space<vmem>>, vector<8x1x1x8xf32>
    %90 = vector.shape_cast %89 : vector<8x1x1x8xf32> to vector<8x8xf32>
    %91 = vector.shape_cast %88 : vector<8x8xf32> to vector<8x1x1x8xf32>
    tpu.vector_store %arg4[%c0_40, %c0_41, %c3, %c0_42], %91 {strides = array<i32>} : memref<8x1x4x8xf32, #tpu.memory_space<vmem>>, vector<8x1x1x8xf32>,
    return
  }
  func.func @transform_0(%arg0: i32) -> (i32, i32, i32, i32, i32) {
    %c0_i32 = arith.constant 0 : i32
    %c0_i32_0 = arith.constant 0 : i32
    %c0_i32_1 = arith.constant 0 : i32
    %c0_i32_2 = arith.constant 0 : i32
    %c0_i32_3 = arith.constant 0 : i32
    return %c0_i32, %arg0, %c0_i32_0, %c0_i32_1, %c0_i32_2 : i32, i32, i32, i32, i32
  }
  func.func @transform_1(%arg0: i32) -> (i32, i32, i32, i32, i32) {
    %c0_i32 = arith.constant 0 : i32
    %c1_i32 = arith.constant 1 : i32
    %c0_i32_0 = arith.constant 0 : i32
    %c0_i32_1 = arith.constant 0 : i32
    %c0_i32_2 = arith.constant 0 : i32
    return %c0_i32, %arg0, %c1_i32, %c0_i32_0, %c0_i32_1 : i32, i32, i32, i32, i32
  }
  func.func @transform_2(%arg0: i32) -> (i32, i32, i32, i32, i32) {
    %c0_i32 = arith.constant 0 : i32
    %c2_i32 = arith.constant 2 : i32
    %c0_i32_0 = arith.constant 0 : i32
    %c0_i32_1 = arith.constant 0 : i32
    %c0_i32_2 = arith.constant 0 : i32
    return %c0_i32, %arg0, %c2_i32, %c0_i32_0, %c0_i32_1 : i32, i32, i32, i32, i32
  }
  func.func @transform_3(%arg0: i32) -> (i32, i32, i32, i32) {
    %c0_i32 = arith.constant 0 : i32
    %c0_i32_0 = arith.constant 0 : i32
    %c0_i32_1 = arith.constant 0 : i32
    %c0_i32_2 = arith.constant 0 : i32
    return %c0_i32, %arg0, %c0_i32_0, %c0_i32_1 : i32, i32, i32, i32
  }
}

module attributes {stable_mosaic.version = 11 : i64} {
  func.func @_proj_add_ln_kernel(%arg0: i32, %arg1: memref<16x32xf32, #tpu.memory_space<vmem>>, %arg2: memref<32x32xf32, #tpu.memory_space<vmem>>, %arg3: memref<1x32xf32, #tpu.memory_space<vmem>>, %arg4: memref<16x32xf32, #tpu.memory_space<vmem>>, %arg5: memref<1x32xf32, #tpu.memory_space<vmem>>, %arg6: memref<1x32xf32, #tpu.memory_space<vmem>>, %arg7: memref<16x32xf32, #tpu.memory_space<vmem>>) attributes {dimension_semantics = [#tpu.dimension_semantics<parallel>], iteration_bounds = array<i64: 1>, scalar_prefetch = 0 : i64, scratch_operands = 0 : i64, tpu.core_type = #tpu.core_type<tc>, window_params = [{transform_indices = @transform_0, window_bounds = array<i64: 16, 32>}, {pipeline_mode = #tpu.pipeline_mode<synchronous>, transform_indices = @transform_1, window_bounds = array<i64: 32, 32>}, {pipeline_mode = #tpu.pipeline_mode<synchronous>, transform_indices = @transform_2, window_bounds = array<i64: 1, 32>}, {transform_indices = @transform_3, window_bounds = array<i64: 16, 32>}, {pipeline_mode = #tpu.pipeline_mode<synchronous>, transform_indices = @transform_4, window_bounds = array<i64: 1, 32>}, {pipeline_mode = #tpu.pipeline_mode<synchronous>, transform_indices = @transform_5, window_bounds = array<i64: 1, 32>}, {transform_indices = @transform_6, window_bounds = array<i64: 16, 32>}]} {
    %c0 = arith.constant 0 : index
    %c0_0 = arith.constant 0 : index
    %0 = vector.load %arg1[%c0, %c0_0] : memref<16x32xf32, #tpu.memory_space<vmem>>, vector<16x32xf32>
    %c0_1 = arith.constant 0 : index
    %c0_2 = arith.constant 0 : index
    %1 = vector.load %arg2[%c0_1, %c0_2] : memref<32x32xf32, #tpu.memory_space<vmem>>, vector<32x32xf32>
    %cst = arith.constant dense<0.000000e+00> : vector<16x32xf32>
    %2 = tpu.matmul %0, %1, %cst {dimension_numbers = #tpu.dot_dimension_numbers<[1], [0], [0], [1], [0, 0, 1, 1], [], []>} : vector<16x32xf32>, vector<32x32xf32>, vector<16x32xf32> -> vector<16x32xf32>
    %c0_3 = arith.constant 0 : index
    %c0_4 = arith.constant 0 : index
    %3 = vector.load %arg3[%c0_3, %c0_4] : memref<1x32xf32, #tpu.memory_space<vmem>>, vector<1x32xf32>
    %4 = vector.broadcast %3 : vector<1x32xf32> to vector<16x32xf32>
    %5 = arith.addf %2, %4 : vector<16x32xf32>
    %c0_5 = arith.constant 0 : index
    %c0_6 = arith.constant 0 : index
    %6 = vector.load %arg4[%c0_5, %c0_6] : memref<16x32xf32, #tpu.memory_space<vmem>>, vector<16x32xf32>
    %7 = arith.addf %5, %6 : vector<16x32xf32>
    %cst_7 = arith.constant dense<0.000000e+00> : vector<16xf32>
    %8 = vector.multi_reduction <add>, %7, %cst_7 [1] : vector<16x32xf32> to vector<16xf32>
    %9 = vector.shape_cast %8 : vector<16xf32> to vector<16x1xf32>
    %cst_8 = arith.constant 3.200000e+01 : f32
    %10 = vector.broadcast %cst_8 : f32 to vector<16x1xf32>
    %11 = arith.divf %9, %10 : vector<16x1xf32>
    %12 = vector.broadcast %11 : vector<16x1xf32> to vector<16x32xf32>
    %13 = arith.subf %7, %12 : vector<16x32xf32>
    %14 = arith.mulf %13, %13 : vector<16x32xf32>
    %cst_9 = arith.constant dense<0.000000e+00> : vector<16xf32>
    %15 = vector.multi_reduction <add>, %14, %cst_9 [1] : vector<16x32xf32> to vector<16xf32>
    %16 = vector.shape_cast %15 : vector<16xf32> to vector<16x1xf32>
    %cst_10 = arith.constant 3.200000e+01 : f32
    %17 = vector.broadcast %cst_10 : f32 to vector<16x1xf32>
    %18 = arith.divf %16, %17 : vector<16x1xf32>
    %cst_11 = arith.constant 9.99999974E-6 : f32
    %19 = vector.broadcast %cst_11 : f32 to vector<16x1xf32>
    %20 = arith.addf %18, %19 : vector<16x1xf32>
    %21 = math.rsqrt %20 : vector<16x1xf32>
    %22 = vector.broadcast %21 : vector<16x1xf32> to vector<16x32xf32>
    %23 = arith.mulf %13, %22 : vector<16x32xf32>
    %c0_12 = arith.constant 0 : index
    %c0_13 = arith.constant 0 : index
    %24 = vector.load %arg5[%c0_12, %c0_13] : memref<1x32xf32, #tpu.memory_space<vmem>>, vector<1x32xf32>
    %25 = vector.broadcast %24 : vector<1x32xf32> to vector<16x32xf32>
    %26 = arith.mulf %23, %25 : vector<16x32xf32>
    %c0_14 = arith.constant 0 : index
    %c0_15 = arith.constant 0 : index
    %27 = vector.load %arg6[%c0_14, %c0_15] : memref<1x32xf32, #tpu.memory_space<vmem>>, vector<1x32xf32>
    %28 = vector.broadcast %27 : vector<1x32xf32> to vector<16x32xf32>
    %29 = arith.addf %26, %28 : vector<16x32xf32>
    %c0_16 = arith.constant 0 : index
    %c0_17 = arith.constant 0 : index
    %30 = vector.load %arg7[%c0_16, %c0_17] : memref<16x32xf32, #tpu.memory_space<vmem>>, vector<16x32xf32>
    tpu.vector_store %arg7[%c0_16, %c0_17], %29 {strides = array<i32>} : memref<16x32xf32, #tpu.memory_space<vmem>>, vector<16x32xf32>,
    return
  }
  func.func @transform_0(%arg0: i32) -> (i32, i32) {
    %c0_i32 = arith.constant 0 : i32
    %c0_i32_0 = arith.constant 0 : i32
    return %arg0, %c0_i32 : i32, i32
  }
  func.func @transform_1(%arg0: i32) -> (i32, i32) {
    %c0_i32 = arith.constant 0 : i32
    %c0_i32_0 = arith.constant 0 : i32
    %c0_i32_1 = arith.constant 0 : i32
    return %c0_i32, %c0_i32_0 : i32, i32
  }
  func.func @transform_2(%arg0: i32) -> (i32, i32) {
    %c0_i32 = arith.constant 0 : i32
    %c0_i32_0 = arith.constant 0 : i32
    %c0_i32_1 = arith.constant 0 : i32
    return %c0_i32, %c0_i32_0 : i32, i32
  }
  func.func @transform_3(%arg0: i32) -> (i32, i32) {
    %c0_i32 = arith.constant 0 : i32
    %c0_i32_0 = arith.constant 0 : i32
    return %arg0, %c0_i32 : i32, i32
  }
  func.func @transform_4(%arg0: i32) -> (i32, i32) {
    %c0_i32 = arith.constant 0 : i32
    %c0_i32_0 = arith.constant 0 : i32
    %c0_i32_1 = arith.constant 0 : i32
    return %c0_i32, %c0_i32_0 : i32, i32
  }
  func.func @transform_5(%arg0: i32) -> (i32, i32) {
    %c0_i32 = arith.constant 0 : i32
    %c0_i32_0 = arith.constant 0 : i32
    %c0_i32_1 = arith.constant 0 : i32
    return %c0_i32, %c0_i32_0 : i32, i32
  }
  func.func @transform_6(%arg0: i32) -> (i32, i32) {
    %c0_i32 = arith.constant 0 : i32
    %c0_i32_0 = arith.constant 0 : i32
    return %arg0, %c0_i32 : i32, i32
  }
}

module attributes {stable_mosaic.version = 11 : i64} {
  func.func @_ffn_ln_kernel(%arg0: i32, %arg1: memref<16x32xf32, #tpu.memory_space<vmem>>, %arg2: memref<32x64xf32, #tpu.memory_space<vmem>>, %arg3: memref<1x64xf32, #tpu.memory_space<vmem>>, %arg4: memref<64x32xf32, #tpu.memory_space<vmem>>, %arg5: memref<1x32xf32, #tpu.memory_space<vmem>>, %arg6: memref<1x32xf32, #tpu.memory_space<vmem>>, %arg7: memref<1x32xf32, #tpu.memory_space<vmem>>, %arg8: memref<16x32xf32, #tpu.memory_space<vmem>>) attributes {dimension_semantics = [#tpu.dimension_semantics<parallel>], iteration_bounds = array<i64: 1>, scalar_prefetch = 0 : i64, scratch_operands = 0 : i64, tpu.core_type = #tpu.core_type<tc>, window_params = [{transform_indices = @transform_0, window_bounds = array<i64: 16, 32>}, {pipeline_mode = #tpu.pipeline_mode<synchronous>, transform_indices = @transform_1, window_bounds = array<i64: 32, 64>}, {pipeline_mode = #tpu.pipeline_mode<synchronous>, transform_indices = @transform_2, window_bounds = array<i64: 1, 64>}, {pipeline_mode = #tpu.pipeline_mode<synchronous>, transform_indices = @transform_3, window_bounds = array<i64: 64, 32>}, {pipeline_mode = #tpu.pipeline_mode<synchronous>, transform_indices = @transform_4, window_bounds = array<i64: 1, 32>}, {pipeline_mode = #tpu.pipeline_mode<synchronous>, transform_indices = @transform_5, window_bounds = array<i64: 1, 32>}, {pipeline_mode = #tpu.pipeline_mode<synchronous>, transform_indices = @transform_6, window_bounds = array<i64: 1, 32>}, {transform_indices = @transform_7, window_bounds = array<i64: 16, 32>}]} {
    %c0 = arith.constant 0 : index
    %c0_0 = arith.constant 0 : index
    %0 = vector.load %arg1[%c0, %c0_0] : memref<16x32xf32, #tpu.memory_space<vmem>>, vector<16x32xf32>
    %c0_1 = arith.constant 0 : index
    %c0_2 = arith.constant 0 : index
    %1 = vector.load %arg2[%c0_1, %c0_2] : memref<32x64xf32, #tpu.memory_space<vmem>>, vector<32x64xf32>
    %cst = arith.constant dense<0.000000e+00> : vector<16x64xf32>
    %2 = tpu.matmul %0, %1, %cst {dimension_numbers = #tpu.dot_dimension_numbers<[1], [0], [0], [1], [0, 0, 1, 1], [], []>} : vector<16x32xf32>, vector<32x64xf32>, vector<16x64xf32> -> vector<16x64xf32>
    %c0_3 = arith.constant 0 : index
    %c0_4 = arith.constant 0 : index
    %3 = vector.load %arg3[%c0_3, %c0_4] : memref<1x64xf32, #tpu.memory_space<vmem>>, vector<1x64xf32>
    %4 = vector.broadcast %3 : vector<1x64xf32> to vector<16x64xf32>
    %5 = arith.addf %2, %4 : vector<16x64xf32>
    %cst_5 = arith.constant 0.000000e+00 : f32
    %6 = vector.broadcast %cst_5 : f32 to vector<16x64xf32>
    %7 = arith.maximumf %5, %6 : vector<16x64xf32>
    %c0_6 = arith.constant 0 : index
    %c0_7 = arith.constant 0 : index
    %8 = vector.load %arg4[%c0_6, %c0_7] : memref<64x32xf32, #tpu.memory_space<vmem>>, vector<64x32xf32>
    %cst_8 = arith.constant dense<0.000000e+00> : vector<16x32xf32>
    %9 = tpu.matmul %7, %8, %cst_8 {dimension_numbers = #tpu.dot_dimension_numbers<[1], [0], [0], [1], [0, 0, 1, 1], [], []>} : vector<16x64xf32>, vector<64x32xf32>, vector<16x32xf32> -> vector<16x32xf32>
    %c0_9 = arith.constant 0 : index
    %c0_10 = arith.constant 0 : index
    %10 = vector.load %arg5[%c0_9, %c0_10] : memref<1x32xf32, #tpu.memory_space<vmem>>, vector<1x32xf32>
    %11 = vector.broadcast %10 : vector<1x32xf32> to vector<16x32xf32>
    %12 = arith.addf %9, %11 : vector<16x32xf32>
    %13 = arith.addf %12, %0 : vector<16x32xf32>
    %cst_11 = arith.constant dense<0.000000e+00> : vector<16xf32>
    %14 = vector.multi_reduction <add>, %13, %cst_11 [1] : vector<16x32xf32> to vector<16xf32>
    %15 = vector.shape_cast %14 : vector<16xf32> to vector<16x1xf32>
    %cst_12 = arith.constant 3.200000e+01 : f32
    %16 = vector.broadcast %cst_12 : f32 to vector<16x1xf32>
    %17 = arith.divf %15, %16 : vector<16x1xf32>
    %18 = vector.broadcast %17 : vector<16x1xf32> to vector<16x32xf32>
    %19 = arith.subf %13, %18 : vector<16x32xf32>
    %20 = arith.mulf %19, %19 : vector<16x32xf32>
    %cst_13 = arith.constant dense<0.000000e+00> : vector<16xf32>
    %21 = vector.multi_reduction <add>, %20, %cst_13 [1] : vector<16x32xf32> to vector<16xf32>
    %22 = vector.shape_cast %21 : vector<16xf32> to vector<16x1xf32>
    %cst_14 = arith.constant 3.200000e+01 : f32
    %23 = vector.broadcast %cst_14 : f32 to vector<16x1xf32>
    %24 = arith.divf %22, %23 : vector<16x1xf32>
    %cst_15 = arith.constant 9.99999974E-6 : f32
    %25 = vector.broadcast %cst_15 : f32 to vector<16x1xf32>
    %26 = arith.addf %24, %25 : vector<16x1xf32>
    %27 = math.rsqrt %26 : vector<16x1xf32>
    %28 = vector.broadcast %27 : vector<16x1xf32> to vector<16x32xf32>
    %29 = arith.mulf %19, %28 : vector<16x32xf32>
    %c0_16 = arith.constant 0 : index
    %c0_17 = arith.constant 0 : index
    %30 = vector.load %arg6[%c0_16, %c0_17] : memref<1x32xf32, #tpu.memory_space<vmem>>, vector<1x32xf32>
    %31 = vector.broadcast %30 : vector<1x32xf32> to vector<16x32xf32>
    %32 = arith.mulf %29, %31 : vector<16x32xf32>
    %c0_18 = arith.constant 0 : index
    %c0_19 = arith.constant 0 : index
    %33 = vector.load %arg7[%c0_18, %c0_19] : memref<1x32xf32, #tpu.memory_space<vmem>>, vector<1x32xf32>
    %34 = vector.broadcast %33 : vector<1x32xf32> to vector<16x32xf32>
    %35 = arith.addf %32, %34 : vector<16x32xf32>
    %c0_20 = arith.constant 0 : index
    %c0_21 = arith.constant 0 : index
    %36 = vector.load %arg8[%c0_20, %c0_21] : memref<16x32xf32, #tpu.memory_space<vmem>>, vector<16x32xf32>
    tpu.vector_store %arg8[%c0_20, %c0_21], %35 {strides = array<i32>} : memref<16x32xf32, #tpu.memory_space<vmem>>, vector<16x32xf32>,
    return
  }
  func.func @transform_0(%arg0: i32) -> (i32, i32) {
    %c0_i32 = arith.constant 0 : i32
    %c0_i32_0 = arith.constant 0 : i32
    return %arg0, %c0_i32 : i32, i32
  }
  func.func @transform_1(%arg0: i32) -> (i32, i32) {
    %c0_i32 = arith.constant 0 : i32
    %c0_i32_0 = arith.constant 0 : i32
    %c0_i32_1 = arith.constant 0 : i32
    return %c0_i32, %c0_i32_0 : i32, i32
  }
  func.func @transform_2(%arg0: i32) -> (i32, i32) {
    %c0_i32 = arith.constant 0 : i32
    %c0_i32_0 = arith.constant 0 : i32
    %c0_i32_1 = arith.constant 0 : i32
    return %c0_i32, %c0_i32_0 : i32, i32
  }
  func.func @transform_3(%arg0: i32) -> (i32, i32) {
    %c0_i32 = arith.constant 0 : i32
    %c0_i32_0 = arith.constant 0 : i32
    %c0_i32_1 = arith.constant 0 : i32
    return %c0_i32, %c0_i32_0 : i32, i32
  }
  func.func @transform_4(%arg0: i32) -> (i32, i32) {
    %c0_i32 = arith.constant 0 : i32
    %c0_i32_0 = arith.constant 0 : i32
    %c0_i32_1 = arith.constant 0 : i32
    return %c0_i32, %c0_i32_0 : i32, i32
  }
  func.func @transform_5(%arg0: i32) -> (i32, i32) {
    %c0_i32 = arith.constant 0 : i32
    %c0_i32_0 = arith.constant 0 : i32
    %c0_i32_1 = arith.constant 0 : i32
    return %c0_i32, %c0_i32_0 : i32, i32
  }
  func.func @transform_6(%arg0: i32) -> (i32, i32) {
    %c0_i32 = arith.constant 0 : i32
    %c0_i32_0 = arith.constant 0 : i32
    %c0_i32_1 = arith.constant 0 : i32
    return %c0_i32, %c0_i32_0 : i32, i32
  }
  func.func @transform_7(%arg0: i32) -> (i32, i32) {
    %c0_i32 = arith.constant 0 : i32
    %c0_i32_0 = arith.constant 0 : i32
    return %arg0, %c0_i32 : i32, i32
  }
}

</mosaic_0001>

<bundles_post_ra>
// kernel: transformer_sentence_encoder_layer.4
= control target key start
LH: loop header
LB: loop body
LE: loop exit
PB: predicated region body
PF: predicated region fallthrough
CT: control target
= control target key end

     0   :  { %8 = vsyncpa [#allocation3], 0  ;;  %s197_s0 = inlined_call_operand.hbm [shape: f32[16,32], index: 0, kind: input, shape index: {}]   ;;  %s198_s1 = inlined_call_operand.hbm [shape: f32[32,96], index: 1, kind: input, shape index: {}]   ;;  %s199_s2 = inlined_call_operand.vmem [shape: f32[1,96], index: 2, kind: input, shape index: {}]   ;;  %s200_s3 = inlined_call_operand.vmem [shape: f32[16,96], index: 3, kind: output, shape index: {}]  }
   0x1   :  { %s14_s14 = sshll.u32 %s197_s0, 4  ;;  %s15_s14 = int_to_ptr.hbm [resolvable:$true] %s14_s14 }
   0x2   :  { %9 = vsyncpa [#allocation5], 0  ;;  %s158_s15 = smov [#allocation2]   ;;  %s27_s19 = sshll.u32 %s198_s1, 4  ;;  %s28_s19 = int_to_ptr.hbm [resolvable:$true] %s27_s19 }
   0x3   :  { %s16_s16 = sshll.u32 %s158_s15, 4  ;;  %s159_s20 = smov 128   ;;  %s17_s16 = int_to_ptr.vmem [resolvable:$true] %s16_s16 }
   0x4   :  { %s160_s21 = smov 8   ;;  %s161_s22 = smov [#allocation4]  }
   0x5   :  { %22 = dma.hbm_to_vmem [thread:$0]  %s15_s14, 256, %s17_s16, [#allocation3], %s159_s20, %s159_s20, %s160_s21  }
   0x6   :  { %s29_s23 = sshll.u32 %s161_s22, 4  ;;  %s30_s23 = int_to_ptr.vmem [resolvable:$true] %s29_s23 }
   0x7   :  { %35 = dma.hbm_to_vmem [thread:$0]  %s28_s19, 512, %s30_s23, [#allocation5], %s159_s20, %s159_s20, %s160_s21  }
   0x8   :  { %154 = dma.done.wait [#allocation3], 256  }
   0x9   :  { %155 = vsyncadd [#allocation3], 4294967040 }
   0xa   :  { %156 = dma.done.wait [#allocation5], 512  }
   0xb   :  { %157 = vsyncadd [#allocation5], 4294966784  ;;  %v51_v0 = vld [vmem:[#allocation4 + $0x18] sm:$0xff]  ;;  %v50_v1 = vld [vmem:[#allocation4 + $0x10] sm:$0xff]  ;;  %vm56_vm0 = vcmask 261120   ;;  %vm86_vm1 = vcmask 785408  }
   0xc   :  { %75 = vmatpush.msra.mxu0 %v51_v0  ;;  %97 = vmatpush.msra.mxu1 %v51_v0  ;;  %v49_v2 = vld [vmem:[#allocation4 + $0x8] sm:$0xff]  ;;  %v48_v3 = vld [vmem:[#allocation4] sm:$0xff]  ;;  %v46_v4 = vld [vmem:[#allocation2] sm:$0xff] }
   0xd   :  { %v47_v5 = vld [vmem:[#allocation2 + $0x8] sm:$0xff]  ;;  %v105_v6 = vld [vmem:[%s199_s2] ss:$0 sm:$0xff] }
   0xe   :  { %76 = vmatpush.msra.mxu0 %v50_v1  ;;  %98 = vmatpush.msra.mxu1 %v50_v1 }
  0x10   :  { %77 = vmatpush.msra.mxu0 %v49_v2  ;;  %99 = vmatpush.msra.mxu1 %v49_v2 }
  0x12   :  { %78 = vmatpush.msra.mxu0 %v48_v3  ;;  %100 = vmatpush.msra.mxu1 %v48_v3 }
  0x13   :  { %95 = vmatmul.msk.f32.vlgmr.msra.gmra.mxu0 %vm56_vm0, %v46_v4  ;;  %96 = vmatmul.msk.f32.vlgmr.msra.gmra.mxu1 %vm56_vm0, %v47_v5 }
  0x90   :  { %v80_v7 = vpop.f32.mrf.mxu0  ;;  %v83_v8 = vpop.f32.mrf.mxu1 }
  0x91   :  { %v81_v9 = vadd.f32 %v105_v6, %v80_v7  ;;  %v84_v10 = vadd.f32 %v105_v6, %v83_v8 }
  0x93   :  { %87 = vst.msk [vmem:[%s200_s3] sm:$0xff] %vm86_vm1, %v81_v9 }
  0x94   :  { %88 = vst.msk [vmem:[%s200_s3 + $0x8] sm:$0xff] %vm86_vm1, %v84_v10 }
  0x95   :  { %93 = vsyncpa [#allocation3], 1 }
  0x96   :  { %94 = vsyncpa [#allocation5], 1 }

// kernel: transformer_sentence_encoder_layer.6
= control target key start
LH: loop header
LB: loop body
LE: loop exit
PB: predicated region body
PF: predicated region fallthrough
CT: control target
= control target key end

     0   :  { %vm33_vm0 = vcmask 261120   ;;  %v152_v17 = vmov 32.0   ;;  %s235_s1 = inlined_call_operand.vmem [shape: f32[32,32], index: 1, kind: input, shape index: {}]   ;;  %s236_s2 = inlined_call_operand.vmem [shape: f32[1,32], index: 2, kind: input, shape index: {}]   ;;  %s237_s0 = inlined_call_operand.vmem [shape: f32[16,32], index: 0, kind: input, shape index: {}]   ;;  %s238_s3 = inlined_call_operand.vmem [shape: f32[16,32], index: 3, kind: input, shape index: {}]   ;;  %s239_s4 = inlined_call_operand.vmem [shape: f32[1,32], index: 4, kind: input, shape index: {}]   ;;  %s240_s5 = inlined_call_operand.vmem [shape: f32[1,32], index: 5, kind: input, shape index: {}]   ;;  %s241_s6 = inlined_call_operand.vmem [shape: f32[16,32], index: 6, kind: output, shape index: {}]  }
   0x1   :  { %v28_v0 = vld [vmem:[%s235_s1 + $0x18] sm:$0xff]  ;;  %v27_v1 = vld [vmem:[%s235_s1 + $0x10] sm:$0xff]  ;;  %v26_v2 = vld [vmem:[%s235_s1 + $0x8] sm:$0xff]  ;;  %146 = vrcp.f32 %v152_v17 }
   0x2   :  { %52 = vmatpush.msra.mxu0 %v28_v0  ;;  %138 = vmatpush.msra.mxu1 %v28_v0  ;;  %v25_v3 = vld [vmem:[%s235_s1] sm:$0xff]  ;;  %v24_v5 = vld [vmem:[%s237_s0 + $0x8] sm:$0xff] }
   0x3   :  { %v23_v4 = vld [vmem:[%s237_s0] sm:$0xff]  ;;  %v64_v13 = vld [vmem:[%s238_s3 + $0x8] sm:$0xff] }
   0x4   :  { %53 = vmatpush.msra.mxu0 %v27_v1  ;;  %139 = vmatpush.msra.mxu1 %v27_v1  ;;  %v143_v6 = vld [vmem:[%s236_s2] ss:$0 sm:$0xff] }
   0x5   :  { %v63_v8 = vld [vmem:[%s238_s3] sm:$0xff] }
   0x6   :  { %54 = vmatpush.msra.mxu0 %v26_v2  ;;  %140 = vmatpush.msra.mxu1 %v26_v2  ;;  %v144_v48 = vld [vmem:[%s239_s4] ss:$0 sm:$0xff] }
   0x7   :  { %v147_v18 = vpop.eup %146  ;;  %v145_v51 = vld [vmem:[%s240_s5] ss:$0 sm:$0xff] }
   0x8   :  { %55 = vmatpush.msra.mxu0 %v25_v3  ;;  %141 = vmatpush.msra.mxu1 %v25_v3  ;;  %v74_v19 = vmul.f32 32.0, %v147_v18  ;;  %vm78_vm1 = vweird.f32 %v147_v18 }
   0x9   :  { %136 = vmatmul.msk.f32.vlgmr.msra.gmra.mxu0 %vm33_vm0, %v23_v4  ;;  %137 = vmatmul.msk.f32.vlgmr.msra.gmra.mxu1 %vm33_vm0, %v24_v5 }
   0xa   :  { %v75_v20 = vsub.f32 1.0, %v74_v19 }
   0xc   :  { %v76_v21 = vmul.f32 %v147_v18, %v75_v20 }
   0xe   :  { %v77_v22 = vadd.f32 %v147_v18, %v76_v21 }
  0x10   :  { %v79_v23 = vsel %vm78_vm1, %v147_v18, %v77_v22 }
  0x86   :  { %v57_v7 = vpop.f32.mrf.mxu0  ;;  %v60_v9 = vpop.f32.mrf.mxu1 }
  0x87   :  { %v58_v10 = vadd.f32 %v143_v6, %v57_v7  ;;  %v61_v12 = vadd.f32 %v143_v6, %v60_v9 }
  0x89   :  { %v65_v11 = vadd.f32 %v63_v8, %v58_v10  ;;  %v66_v15 = vadd.f32 %v64_v13, %v61_v12 }
  0x8b   :  { %v67_v14 = vsel %vm33_vm0, %v65_v11, 0.0  ;;  %v70_v16 = vsel %vm33_vm0, %v66_v15, 0.0 }
  0x8c   :  { %68 = vadd.xlane.f32.xlu0 %v67_v14 }
  0x94   :  { %71 = vadd.xlane.f32.xlu0 %v70_v16 }
  0xff   :  { %v69_v24 = vpop.xlane.xlu0 %68 }
 0x100   :  { %v80_v25 = vmul.f32 %v79_v23, %v69_v24 }
 0x102   :  { %v82_v26 = vsub.f32 %v65_v11, %v80_v25 }
 0x104   :  { %v84_v27 = vmul.f32 %v82_v26, %v82_v26 }
 0x106   :  { %v86_v28 = vsel %vm33_vm0, %v84_v27, 0.0 }
 0x107   :  { %87 = vadd.xlane.f32.xlu1 %v86_v28  ;;  %v72_v29 = vpop.xlane.xlu0 %71 }
 0x108   :  { %v81_v30 = vmul.f32 %v79_v23, %v72_v29 }
 0x10a   :  { %v83_v31 = vsub.f32 %v66_v15, %v81_v30 }
 0x10c   :  { %v85_v32 = vmul.f32 %v83_v31, %v83_v31 }
 0x10e   :  { %v89_v33 = vsel %vm33_vm0, %v85_v32, 0.0 }
 0x10f   :  { %90 = vadd.xlane.f32.xlu1 %v89_v33 }
 0x17a   :  { %v88_v34 = vpop.xlane.xlu1 %87 }
 0x17b   :  { %v92_v35 = vmul.f32 %v88_v34, %v79_v23 }
 0x17d   :  { %v94_v36 = vadd.f32 1e-05, %v92_v35 }
 0x17f   :  { %148 = vrsqrt.f32 %v94_v36  ;;  %vm102_vm3 = vweird.f32 %v94_v36 }
 0x182   :  { %v91_v37 = vpop.xlane.xlu1 %90 }
 0x183   :  { %v93_v38 = vmul.f32 %v91_v37, %v79_v23 }
 0x185   :  { %v149_v39 = vpop.eup %148  ;;  %v95_v40 = vadd.f32 1e-05, %v93_v38 }
 0x186   :  { %v97_v41 = vmul.f32 %v149_v39, %v94_v36  ;;  %vm103_vm2 = vweird.f32 %v149_v39 }
 0x187   :  { %150 = vrsqrt.f32 %v95_v40  ;;  %vm104_vm4 = vmor %vm102_vm3, %vm103_vm2  ;;  %vm112_vm6 = vweird.f32 %v95_v40 }
 0x188   :  { %v98_v42 = vmul.f32 %v149_v39, %v97_v41 }
 0x18a   :  { %v99_v43 = vmul.f32 0.5, %v98_v42 }
 0x18c   :  { %v100_v44 = vsub.f32 1.5, %v99_v43 }
 0x18d   :  { %v151_v45 = vpop.eup %150 }
 0x18e   :  { %v101_v46 = vmul.f32 %v149_v39, %v100_v44  ;;  %v107_v47 = vmul.f32 %v151_v45, %v95_v40  ;;  %vm113_vm5 = vweird.f32 %v151_v45 }
 0x18f   :  { %vm114_vm7 = vmor %vm112_vm6, %vm113_vm5 }
 0x190   :  { %v105_v49 = vsel %vm104_vm4, %v149_v39, %v101_v46  ;;  %v108_v50 = vmul.f32 %v151_v45, %v107_v47 }
 0x191   :  { %v116_v52 = vmul.f32 %v105_v49, %v82_v26 }
 0x192   :  { %v109_v53 = vmul.f32 0.5, %v108_v50 }
 0x193   :  { %v122_v54 = vmul.f32 %v144_v48, %v116_v52 }
 0x194   :  { %v110_v55 = vsub.f32 1.5, %v109_v53 }
 0x195   :  { %v128_v56 = vadd.f32 %v145_v51, %v122_v54 }
 0x196   :  { %v111_v57 = vmul.f32 %v151_v45, %v110_v55 }
 0x197   :  { %130 = vst.msk [vmem:[%s241_s6] sm:$0xff] %vm33_vm0, %v128_v56 }
 0x198   :  { %v115_v58 = vsel %vm114_vm7, %v151_v45, %v111_v57 }
 0x199   :  { %v117_v59 = vmul.f32 %v115_v58, %v83_v31 }
 0x19b   :  { %v123_v60 = vmul.f32 %v144_v48, %v117_v59 }
 0x19d   :  { %v129_v61 = vadd.f32 %v145_v51, %v123_v60 }
 0x19f   :  { %131 = vst.msk [vmem:[%s241_s6 + $0x8] sm:$0xff] %vm33_vm0, %v129_v61 }

// kernel: transformer_sentence_encoder_layer.7
= control target key start
LH: loop header
LB: loop body
LE: loop exit
PB: predicated region body
PF: predicated region fallthrough
CT: control target
= control target key end

     0   :  { %vm37_vm0 = vcmask 261120   ;;  %s361_s0 = inlined_call_operand.vmem [shape: f32[16,32], index: 0, kind: input, shape index: {}]   ;;  %s362_s1 = inlined_call_operand.vmem [shape: f32[32,64], index: 1, kind: input, shape index: {}]   ;;  %s363_s2 = inlined_call_operand.vmem [shape: f32[1,64], index: 2, kind: input, shape index: {}]   ;;  %s364_s3 = inlined_call_operand.vmem [shape: f32[64,32], index: 3, kind: input, shape index: {}]   ;;  %s365_s4 = inlined_call_operand.vmem [shape: f32[1,32], index: 4, kind: input, shape index: {}]   ;;  %s366_s5 = inlined_call_operand.vmem [shape: f32[1,32], index: 5, kind: input, shape index: {}]   ;;  %s367_s6 = inlined_call_operand.vmem [shape: f32[1,32], index: 6, kind: input, shape index: {}]   ;;  %s368_s7 = inlined_call_operand.hbm [shape: f32[16,32], index: 7, kind: output, shape index: {}]  }
   0x1   :  { %v32_v0 = vld [vmem:[%s362_s1 + $0x18] sm:$0xff]  ;;  %v31_v1 = vld [vmem:[%s362_s1 + $0x10] sm:$0xff]  ;;  %v30_v2 = vld [vmem:[%s362_s1 + $0x8] sm:$0xff] }
   0x2   :  { %56 = vmatpush.msra.mxu0 %v32_v0  ;;  %200 = vmatpush.msra.mxu3 %v32_v0  ;;  %v76_v3 = vld [vmem:[%s364_s3 + $0x38] sm:$0xff]  ;;  %v29_v4 = vld [vmem:[%s362_s1] sm:$0xff]  ;;  %v75_v5 = vld [vmem:[%s364_s3 + $0x30] sm:$0xff] }
   0x3   :  { %v27_v6 = vld [vmem:[%s361_s0] sm:$0xff]  ;;  %96 = vmatpush.msra.mxu1 %v76_v3  ;;  %204 = vmatpush.msra.mxu2 %v76_v3  ;;  %v28_v7 = vld [vmem:[%s361_s0 + $0x8] sm:$0xff] }
   0x4   :  { %57 = vmatpush.msra.mxu0 %v31_v1  ;;  %201 = vmatpush.msra.mxu3 %v31_v1 }
   0x6   :  { %58 = vmatpush.msra.mxu0 %v30_v2  ;;  %202 = vmatpush.msra.mxu3 %v30_v2 }
   0x7   :  { %12 = vsyncpa [#allocation3], 0  ;;  %97 = vmatpush.msra.mxu1 %v75_v5  ;;  %v74_v8 = vld [vmem:[%s364_s3 + $0x28] sm:$0xff]  ;;  %205 = vmatpush.msra.mxu2 %v75_v5  ;;  %v73_v9 = vld [vmem:[%s364_s3 + $0x20] sm:$0xff]  ;;  %vm81_vm1 = vcmask 523264   ;;  %v252_v30 = vmov 32.0  }
   0x8   :  { %59 = vmatpush.msra.mxu0 %v29_v4  ;;  %203 = vmatpush.msra.mxu3 %v29_v4  ;;  %v72_v10 = vld [vmem:[%s364_s3 + $0x18] sm:$0xff]  ;;  %v71_v11 = vld [vmem:[%s364_s3 + $0x10] sm:$0xff]  ;;  %v70_v12 = vld [vmem:[%s364_s3 + $0x8] sm:$0xff]  ;;  %220 = vrcp.f32 %v252_v30  ;;  %s254_s12 = smov 128   ;;  %s255_s13 = smov 8  }
   0x9   :  { %196 = vmatmul.msk.f32.vlgmr.msra.gmra.mxu0 %vm37_vm0, %v27_v6  ;;  %197 = vmatmul.msk.f32.vlgmr.msra.gmra.mxu3 %vm37_vm0, %v28_v7  ;;  %v69_v13 = vld [vmem:[%s364_s3] sm:$0xff] }
   0xa   :  { %98 = vmatpush.msra.mxu1 %v74_v8  ;;  %206 = vmatpush.msra.mxu2 %v74_v8  ;;  %v216_v14 = vld [vmem:[%s363_s2] ss:$0 sm:$0xff] }
   0xb   :  { %v217_v21 = vld [vmem:[%s365_s4] ss:$0 sm:$0xff] }
   0xc   :  { %99 = vmatpush.msra.mxu1 %v73_v9  ;;  %207 = vmatpush.msra.mxu2 %v73_v9  ;;  %v218_v59 = vld [vmem:[%s366_s5] ss:$0 sm:$0xff]  ;;  %s253_s5 = smov [#allocation2]  }
   0xd   :  { %v219_v63 = vld [vmem:[%s367_s6] ss:$0 sm:$0xff]  ;;  %s182_s9 = sshll.u32 %s253_s5, 4  ;;  %s184_s6 = sshll.u32 %s368_s7, 4  ;;  %s183_s9 = int_to_ptr.vmem [resolvable:$true] %s182_s9  ;;  %s185_s6 = int_to_ptr.hbm [resolvable:$true] %s184_s6 }
   0xe   :  { %100 = vmatpush.msra.mxu1 %v72_v10  ;;  %208 = vmatpush.msra.mxu2 %v72_v10  ;;  %v221_v31 = vpop.eup %220 }
   0xf   :  { %v120_v32 = vmul.f32 32.0, %v221_v31  ;;  %vm124_vm2 = vweird.f32 %v221_v31 }
  0x10   :  { %101 = vmatpush.msra.mxu1 %v71_v11  ;;  %209 = vmatpush.msra.mxu2 %v71_v11 }
  0x11   :  { %v121_v33 = vsub.f32 1.0, %v120_v32 }
  0x12   :  { %102 = vmatpush.msra.mxu1 %v70_v12  ;;  %210 = vmatpush.msra.mxu2 %v70_v12 }
  0x13   :  { %v122_v34 = vmul.f32 %v221_v31, %v121_v33 }
  0x14   :  { %103 = vmatpush.msra.mxu1 %v69_v13  ;;  %211 = vmatpush.msra.mxu2 %v69_v13 }
  0x15   :  { %v123_v35 = vadd.f32 %v221_v31, %v122_v34 }
  0x17   :  { %v125_v36 = vsel %vm124_vm2, %v221_v31, %v123_v35 }
  0x86   :  { %v61_v15 = vpop.f32.mrf.mxu0 }
  0x87   :  { %v62_v16 = vadd.f32 %v216_v14, %v61_v15 }
  0x89   :  { %v67_v17 = vmax.f32 %v62_v16, 0.0 }
  0x8b   :  { %198 = vmatmul.msk.f32.vlgmr.msra.gmra.mxu1 %vm81_vm1, %v67_v17 }
  0x8c   :  { %v64_v18 = vpop.f32.mrf.mxu3 }
  0x8d   :  { %v65_v19 = vadd.f32 %v216_v14, %v64_v18 }
  0x8f   :  { %v68_v20 = vmax.f32 %v65_v19, 0.0 }
  0x91   :  { %199 = vmatmul.msk.f32.vlgmr.msra.gmra.mxu2 %vm81_vm1, %v68_v20 }
 0x108   :  { %v105_v22 = vpop.f32.mrf.mxu1 }
 0x109   :  { %v106_v23 = vadd.f32 %v217_v21, %v105_v22 }
 0x10b   :  { %v111_v24 = vadd.f32 %v106_v23, %v27_v6 }
 0x10d   :  { %v113_v25 = vsel %vm37_vm0, %v111_v24, 0.0 }
 0x10e   :  { %114 = vadd.xlane.f32.xlu0 %v113_v25 }
 0x114   :  { %v108_v26 = vpop.f32.mrf.mxu2 }
 0x115   :  { %v109_v27 = vadd.f32 %v217_v21, %v108_v26 }
 0x117   :  { %v112_v28 = vadd.f32 %v109_v27, %v28_v7 }
 0x119   :  { %v116_v29 = vsel %vm37_vm0, %v112_v28, 0.0 }
 0x11a   :  { %117 = vadd.xlane.f32.xlu0 %v116_v29 }
 0x181   :  { %v115_v37 = vpop.xlane.xlu0 %114 }
 0x182   :  { %v126_v38 = vmul.f32 %v125_v36, %v115_v37 }
 0x184   :  { %v128_v39 = vsub.f32 %v111_v24, %v126_v38 }
 0x186   :  { %v130_v40 = vmul.f32 %v128_v39, %v128_v39 }
 0x188   :  { %v132_v41 = vsel %vm37_vm0, %v130_v40, 0.0 }
 0x189   :  { %133 = vadd.xlane.f32.xlu1 %v132_v41 }
 0x18d   :  { %v118_v42 = vpop.xlane.xlu0 %117 }
 0x18e   :  { %v127_v43 = vmul.f32 %v125_v36, %v118_v42 }
 0x190   :  { %v129_v44 = vsub.f32 %v112_v28, %v127_v43 }
 0x192   :  { %v131_v45 = vmul.f32 %v129_v44, %v129_v44 }
 0x194   :  { %v135_v46 = vsel %vm37_vm0, %v131_v45, 0.0 }
 0x195   :  { %136 = vadd.xlane.f32.xlu1 %v135_v46 }
 0x1fc   :  { %v134_v47 = vpop.xlane.xlu1 %133 }
 0x1fd   :  { %v138_v48 = vmul.f32 %v134_v47, %v125_v36 }
 0x1ff   :  { %v140_v49 = vadd.f32 1e-05, %v138_v48 }
 0x201   :  { %222 = vrsqrt.f32 %v140_v49  ;;  %vm148_vm4 = vweird.f32 %v140_v49 }
 0x207   :  { %v223_v50 = vpop.eup %222 }
 0x208   :  { %v143_v51 = vmul.f32 %v223_v50, %v140_v49  ;;  %v137_v52 = vpop.xlane.xlu1 %136  ;;  %vm149_vm3 = vweird.f32 %v223_v50 }
 0x209   :  { %v139_v53 = vmul.f32 %v137_v52, %v125_v36  ;;  %vm150_vm5 = vmor %vm148_vm4, %vm149_vm3 }
 0x20a   :  { %v144_v54 = vmul.f32 %v223_v50, %v143_v51 }
 0x20b   :  { %v141_v55 = vadd.f32 1e-05, %v139_v53 }
 0x20c   :  { %v145_v56 = vmul.f32 0.5, %v144_v54 }
 0x20d   :  { %224 = vrsqrt.f32 %v141_v55  ;;  %vm158_vm7 = vweird.f32 %v141_v55 }
 0x20e   :  { %v146_v57 = vsub.f32 1.5, %v145_v56 }
 0x210   :  { %v147_v58 = vmul.f32 %v223_v50, %v146_v57 }
 0x212   :  { %v151_v60 = vsel %vm150_vm5, %v223_v50, %v147_v58 }
 0x213   :  { %v225_v61 = vpop.eup %224  ;;  %v162_v62 = vmul.f32 %v151_v60, %v128_v39 }
 0x214   :  { %v153_v0 = vmul.f32 %v225_v61, %v141_v55  ;;  %vm159_vm6 = vweird.f32 %v225_v61 }
 0x215   :  { %v168_v1 = vmul.f32 %v218_v59, %v162_v62  ;;  %vm160_vm8 = vmor %vm158_vm7, %vm159_vm6 }
 0x216   :  { %v154_v2 = vmul.f32 %v225_v61, %v153_v0 }
 0x217   :  { %v174_v3 = vadd.f32 %v219_v63, %v168_v1 }
 0x218   :  { %v155_v4 = vmul.f32 0.5, %v154_v2 }
 0x219   :  { %176 = vst.msk [vmem:[#allocation2] sm:$0xff] %vm37_vm0, %v174_v3 }
 0x21a   :  { %v156_v5 = vsub.f32 1.5, %v155_v4 }
 0x21c   :  { %v157_v6 = vmul.f32 %v225_v61, %v156_v5 }
 0x21e   :  { %v161_v7 = vsel %vm160_vm8, %v225_v61, %v157_v6 }
 0x21f   :  { %v163_v8 = vmul.f32 %v161_v7, %v129_v44 }
 0x221   :  { %v169_v9 = vmul.f32 %v218_v59, %v163_v8 }
 0x223   :  { %v175_v10 = vadd.f32 %v219_v63, %v169_v9 }
 0x225   :  { %177 = vst.msk [vmem:[#allocation2 + $0x8] sm:$0xff] %vm37_vm0, %v175_v10 }
 0x226   :  { %190 = dma.vmem_to_hbm [thread:$0]  %s183_s9, 256, %s185_s6, [#allocation3], %s254_s12, %s254_s12, %s255_s13  }
 0x227   :  { %250 = dma.done.wait [#allocation3], 256  }
 0x228   :  { %251 = vsyncadd [#allocation3], 4294967040 }
 0x229   :  { %195 = vsyncpa [#allocation3], 1 }

// kernel: transformer_sentence_encoder_layer.5
= control target key start
LH: loop header
LB: loop body
LE: loop exit
PB: predicated region body
PF: predicated region fallthrough
CT: control target
= control target key end

     0   :  { %s1290_s12 = smov 0   ;;  %s1292_s13 = smov 0   ;;  %s1702_s0 = inlined_call_operand.vmem [shape: f32[8,2,3,4,8], index: 0, kind: input, shape index: {}, may-alias: {0,1,2}]   ;;  %s1703_s1 = inlined_call_operand.vmem [shape: f32[8,2,3,4,8], index: 1, kind: input, shape index: {}, may-alias: {0,1,2}]   ;;  %s1704_s2 = inlined_call_operand.vmem [shape: f32[8,2,3,4,8], index: 2, kind: input, shape index: {}, may-alias: {0,1,2}]   ;;  %s1705_s3 = inlined_call_operand.vmem [shape: f32[8,2,4,8], index: 3, kind: output, shape index: {}]  }
   0x1   :  { %s1294_s14 = smov 0  }
   0x2 LB: > { %s1158_s15 = sadd.s32 4294967295, %s1268_s14   ;;  %s1307_s16 = sadd.s32 1, %s1268_s14   ;;  %s1268_s14 = sphi %s1294_s14, %s1710_s14   ;;  %s1264_s13 = sphi %s1292_s13, %s1709_s13   ;;  %s1260_s12 = sphi %s1290_s12, %s1708_s12  }
   0x3   : > { %s17_s17 = ssub.s32 %s1268_s14, %s1307_s16  ;;  %s20_s18 = sadd.s32 1, %s1264_s13 }
   0x4   : > { %p18_p0 = scmp.eq.s32.totalorder %s17_s17, 0  ;;  %p27_p1 = scmp.ne.s32.totalorder %s1264_s13, %s1260_s12 }
   0x5   : > { %p28_p2 = scmp.eq.s32.totalorder %s1268_s14, 0  ;;  %p109_p3 = scmp.eq.s32.totalorder %s1158_s15, 1 }
   0x6   : > { %s1318_s19 = scalar_select %p18_p0, %s1264_s13, %s20_s18  }
   0x7   : > { %p1320_p4 = por %p28_p2, %p27_p1  ;;  %p1324_p5 = por %p109_p3, %p27_p1 }
   0x8   : > { %p1161_p6 = scmp.ge.s32.totalorder %s1268_s14, 2 }
   0xa   : > { %131 = sbr.rel (%p1161_p6) target bundleno = 54 (0x36), region = 16 }
   0xf   : > { %134 = sbr.rel (!%p1320_p4) target bundleno = 28 (0x1c), region = 20  ;;  %s136_s22 = sand.u32 (%p1320_p4), 1, %s1264_s13  }
  0x10   : > { %s1205_s23 = smul.u32 (%p1320_p4), 12, %s1268_s14  ;;  %s1162_s24 = sshll.u32 (%p1320_p4), %s136_s22, 5 }
  0x11   : > { %s138_s28 = scalar_lea.vmem (%p1320_p4), [#allocation2], %s1162_s24 }
  0x12   : > { %s141_s27 = scalar_lea.vmem (%p1320_p4), %s1702_s0, %s1205_s23 }
  0x13   : > { %v158_v0 = vld [vmem:[%s141_s27] sm:$0xf] (%p1320_p4)  ;;  %v160_v1 = vld [vmem:[%s141_s27 + $0x18] sm:$0xf] (%p1320_p4)  ;;  %v162_v2 = vld [vmem:[%s141_s27 + $0x30] sm:$0xf] (%p1320_p4) }
  0x14   : > { %159 = vst [vmem:[%s138_s28] sm:$0xf] %v158_v0  ;;  %v164_v3 = vld [vmem:[%s141_s27 + $0x48] sm:$0xf]  ;;  %v166_v4 = vld [vmem:[%s141_s27 + $0x60] sm:$0xf] }
  0x15   : > { %161 = vst [vmem:[%s138_s28 + $0x4] sm:$0xf] %v160_v1  ;;  %v168_v5 = vld [vmem:[%s141_s27 + $0x78] sm:$0xf]  ;;  %v170_v6 = vld [vmem:[%s141_s27 + $0x90] sm:$0xf] }
  0x16   : > { %163 = vst [vmem:[%s138_s28 + $0x8] sm:$0xf] %v162_v2  ;;  %v172_v7 = vld [vmem:[%s141_s27 + $0xa8] sm:$0xf] }
  0x17   : > { %165 = vst [vmem:[%s138_s28 + $0xc] sm:$0xf] %v164_v3 }
  0x18   : > { %167 = vst [vmem:[%s138_s28 + $0x10] sm:$0xf] %v166_v4 }
  0x19   : > { %169 = vst [vmem:[%s138_s28 + $0x14] sm:$0xf] %v168_v5 }
  0x1a   : > { %171 = vst [vmem:[%s138_s28 + $0x18] sm:$0xf] %v170_v6 }
  0x1b   : > { %173 = vst [vmem:[%s138_s28 + $0x1c] sm:$0xf] %v172_v7 }
  0x1c PF: > { %213 = sbr.rel (!%p1320_p4) target bundleno = 41 (0x29), region = 61  ;;  %s215_s29 = sand.u32 (%p1320_p4), 1, %s1264_s13  }
  0x1d   : > { %s1165_s30 = smul.u32 (%p1320_p4), 12, %s1268_s14  ;;  %s1164_s4 = sshll.u32 (%p1320_p4), %s215_s29, 5 }
  0x1e   : > { %s217_s8 = scalar_lea.vmem (%p1320_p4), [#allocation3], %s1164_s4 }
  0x1f   : > { %s1082_s7 = scalar_lea.vmem (%p1320_p4), %s1703_s1, %s1165_s30 }
  0x20   : > { %v1166_v8 = vld [vmem:[%s1082_s7 + $0x4] sm:$0xf] (%p1320_p4)  ;;  %v1167_v9 = vld [vmem:[%s1082_s7 + $0x1c] sm:$0xf] (%p1320_p4)  ;;  %v1168_v10 = vld [vmem:[%s1082_s7 + $0x34] sm:$0xf] (%p1320_p4) }
  0x21   : > { %239 = vst [vmem:[%s217_s8] sm:$0xf] %v1166_v8  ;;  %v1169_v11 = vld [vmem:[%s1082_s7 + $0x4c] sm:$0xf]  ;;  %v1170_v12 = vld [vmem:[%s1082_s7 + $0x64] sm:$0xf] }
  0x22   : > { %241 = vst [vmem:[%s217_s8 + $0x4] sm:$0xf] %v1167_v9  ;;  %v1171_v13 = vld [vmem:[%s1082_s7 + $0x7c] sm:$0xf]  ;;  %v1172_v14 = vld [vmem:[%s1082_s7 + $0x94] sm:$0xf] }
  0x23   : > { %243 = vst [vmem:[%s217_s8 + $0x8] sm:$0xf] %v1168_v10  ;;  %v1173_v15 = vld [vmem:[%s1082_s7 + $0xac] sm:$0xf] }
  0x24   : > { %245 = vst [vmem:[%s217_s8 + $0xc] sm:$0xf] %v1169_v11 }
  0x25   : > { %247 = vst [vmem:[%s217_s8 + $0x10] sm:$0xf] %v1170_v12 }
  0x26   : > { %249 = vst [vmem:[%s217_s8 + $0x14] sm:$0xf] %v1171_v13 }
  0x27   : > { %251 = vst [vmem:[%s217_s8 + $0x18] sm:$0xf] %v1172_v14 }
  0x28   : > { %253 = vst [vmem:[%s217_s8 + $0x1c] sm:$0xf] %v1173_v15 }
  0x29 PF: > { %293 = sbr.rel (!%p1320_p4) target bundleno = 54 (0x36), region = 102  ;;  %s295_s9 = sand.u32 (%p1320_p4), 1, %s1264_s13  }
  0x2a   : > { %s1175_s10 = smul.u32 (%p1320_p4), 12, %s1268_s14  ;;  %s1174_s11 = sshll.u32 (%p1320_p4), %s295_s9, 5 }
  0x2b   : > { %s297_s23 = scalar_lea.vmem (%p1320_p4), [#allocation4], %s1174_s11 }
  0x2c   : > { %s1088_s22 = scalar_lea.vmem (%p1320_p4), %s1704_s2, %s1175_s10 }
  0x2d   : > { %v1176_v16 = vld [vmem:[%s1088_s22 + $0x8] sm:$0xf] (%p1320_p4)  ;;  %v1177_v17 = vld [vmem:[%s1088_s22 + $0x20] sm:$0xf] (%p1320_p4)  ;;  %v1178_v18 = vld [vmem:[%s1088_s22 + $0x38] sm:$0xf] (%p1320_p4) }
  0x2e   : > { %319 = vst [vmem:[%s297_s23] sm:$0xf] %v1176_v16  ;;  %v1179_v19 = vld [vmem:[%s1088_s22 + $0x50] sm:$0xf]  ;;  %v1180_v20 = vld [vmem:[%s1088_s22 + $0x68] sm:$0xf] }
  0x2f   : > { %321 = vst [vmem:[%s297_s23 + $0x4] sm:$0xf] %v1177_v17  ;;  %v1181_v21 = vld [vmem:[%s1088_s22 + $0x80] sm:$0xf]  ;;  %v1182_v22 = vld [vmem:[%s1088_s22 + $0x98] sm:$0xf] }
  0x30   : > { %323 = vst [vmem:[%s297_s23 + $0x8] sm:$0xf] %v1178_v18  ;;  %v1183_v23 = vld [vmem:[%s1088_s22 + $0xb0] sm:$0xf] }
  0x31   : > { %325 = vst [vmem:[%s297_s23 + $0xc] sm:$0xf] %v1179_v19 }
  0x32   : > { %327 = vst [vmem:[%s297_s23 + $0x10] sm:$0xf] %v1180_v20 }
  0x33   : > { %329 = vst [vmem:[%s297_s23 + $0x14] sm:$0xf] %v1181_v21 }
  0x34   : > { %331 = vst [vmem:[%s297_s23 + $0x18] sm:$0xf] %v1182_v22 }
  0x35   : > { %333 = vst [vmem:[%s297_s23 + $0x1c] sm:$0xf] %v1183_v23 }
  0x36 PF: > { %p1184_p7 = scmp.ge.s32.totalorder %s1268_s14, 1  ;;  %p372_p8 = scmp.lt.s32.totalorder %s1268_s14, 3 }
  0x38   : > { %p373_p9 = pnand %p1184_p7, %p372_p8 }
  0x39   : > { %s379_s20 = sand.u32 (!%p373_p9), 1, %s1260_s12  }
  0x3a   : > { %376 = sbr.rel (%p373_p9) target bundleno = 999 (0x3e7), region = 143  ;;  %s1353_s24 = sshll.u32 (!%p373_p9), %s379_s20, 5 }
  0x3b   : > { %s388_s25 = scalar_lea.vmem (!%p373_p9), [#allocation3], %s1353_s24  ;;  %s381_s12 = scalar_lea.vmem (!%p373_p9), [#allocation2], %s1353_s24 }
  0x3c   : > { %s395_s26 = scalar_lea.vmem (!%p373_p9), [#allocation4], %s1353_s24  ;;  %s1576_s27 = scalar_lea.vmem (!%p373_p9), [#allocation5], %s1353_s24 }
  0x3f   : > { %vm464_vm0 = vcmask 1041409   ;;  %vm467_vm1 = vcmask 1042434   ;;  %vm470_vm2 = vcmask 1043459   ;;  %vm473_vm3 = vcmask 1044484   ;;  %v1356_v24 = vld [vmem:[%s388_s25] sm:$0xf] }
  0x40   : > { %vm476_vm4 = vcmask 1045509   ;;  %vm479_vm5 = vcmask 1046534   ;;  %vm482_vm6 = vcmask 1047559   ;;  %v1358_v25 = vld [vmem:[%s388_s25 + $0x4] sm:$0xf]  ;;  %vm506_vm7 = vcmask 64512  }
  0x41   : > { %v1360_v26 = vld [vmem:[%s388_s25 + $0x8] sm:$0xf]  ;;  %v1362_v27 = vld [vmem:[%s388_s25 + $0xc] sm:$0xf]  ;;  %v1364_v28 = vld [vmem:[%s388_s25 + $0x10] sm:$0xf] }
  0x42   : > { %v1366_v29 = vld [vmem:[%s388_s25 + $0x14] sm:$0xf]  ;;  %v1368_v30 = vld [vmem:[%s388_s25 + $0x18] sm:$0xf]  ;;  %v1370_v31 = vld [vmem:[%s388_s25 + $0x1c] sm:$0xf] }
  0x43   : > { %v492_v32 = vrot.slane %v1358_v25, 7  ;;  %v494_v33 = vrot.slane %v1360_v26, 6  ;;  %v496_v34 = vrot.slane %v1362_v27, 5  ;;  %v498_v35 = vrot.slane %v1364_v28, 4  ;;  %v423_v40 = vld [vmem:[%s381_s12] sm:$0xf] }
  0x44   : > { %v500_v36 = vrot.slane %v1366_v29, 3  ;;  %v502_v38 = vrot.slane %v1368_v30, 2  ;;  %v504_v39 = vrot.slane %v1370_v31, 1  ;;  %v424_v41 = vld [vmem:[%s381_s12 + $0x4] sm:$0xf]  ;;  %v626_v12 = vrot.slane %v1356_v24, 1 }
  0x45   : > { %v493_v37 = vsel %vm464_vm0, %v492_v32, %v1356_v24  ;;  %v425_v43 = vld [vmem:[%s381_s12 + $0x8] sm:$0xf]  ;;  %v426_v44 = vld [vmem:[%s381_s12 + $0xc] sm:$0xf]  ;;  %v427_v45 = vld [vmem:[%s381_s12 + $0x10] sm:$0xf] }
  0x46   : > { %v495_v42 = vsel %vm467_vm1, %v494_v33, %v493_v37  ;;  %v428_v47 = vld [vmem:[%s381_s12 + $0x14] sm:$0xf]  ;;  %v429_v48 = vld [vmem:[%s381_s12 + $0x18] sm:$0xf]  ;;  %v430_v49 = vld [vmem:[%s381_s12 + $0x1c] sm:$0xf]  ;;  %v627_v14 = vsel %vm464_vm0, %v1358_v25, %v626_v12 }
  0x47   : > { %v497_v46 = vsel %vm470_vm2, %v496_v34, %v495_v42  ;;  %v1385_v51 = vmul.f32 0.35355338, %v423_v40  ;;  %v1387_v52 = vmul.f32 0.35355338, %v424_v41  ;;  %v1389_v53 = vmul.f32 0.35355338, %v425_v43 }
  0x48   : > { %v499_v50 = vsel %vm473_vm3, %v498_v35, %v497_v46  ;;  %v1392_v55 = vmul.f32 0.35355338, %v426_v44  ;;  %v1394_v56 = vmul.f32 0.35355338, %v427_v45  ;;  %v1396_v57 = vmul.f32 0.35355338, %v428_v47 }
  0x49   : > { %v501_v54 = vsel %vm476_vm4, %v500_v36, %v499_v50  ;;  %v1399_v59 = vmul.f32 0.35355338, %v429_v48  ;;  %v1401_v60 = vmul.f32 0.35355338, %v430_v49  ;;  %v463_v61 = vrot.slane %v1387_v52, 7  ;;  %s1202_s28 = sshll.u32 (%p1324_p5), %s1158_s15, 2 }
  0x4a   : > { %v503_v58 = vsel %vm479_vm5, %v502_v38, %v501_v54  ;;  %v466_v63 = vrot.slane %v1389_v53, 6  ;;  %v469_v0 = vrot.slane %v1392_v55, 5  ;;  %v472_v1 = vrot.slane %v1394_v56, 4  ;;  %s992_s4 = scalar_lea.vmem (%p1324_p5), %s1705_s3, %s1202_s28 }
  0x4b   : > { %v505_v62 = vsel %vm482_vm6, %v504_v39, %v503_v58  ;;  %v465_v2 = vsel %vm464_vm0, %v463_v61, %v1385_v51  ;;  %v475_v3 = vrot.slane %v1396_v57, 3  ;;  %v478_v5 = vrot.slane %v1399_v59, 2 }
  0x4c   : > { %1189 = vmatpush.xpose.msk.msra.mxu0 %vm506_vm7, %v505_v62  ;;  %v468_v4 = vsel %vm467_vm1, %v466_v63, %v465_v2  ;;  %v481_v7 = vrot.slane %v1401_v60, 1  ;;  %v628_v13 = vrot.slane %v1360_v26, 7  ;;  %v630_v15 = vrot.slane %v1362_v27, 6 }
  0x4d   : > { %v471_v6 = vsel %vm470_vm2, %v469_v0, %v468_v4  ;;  %v632_v17 = vrot.slane %v1364_v28, 5  ;;  %v612_v18 = vrot.slane %v1385_v51, 1  ;;  %v634_v20 = vrot.slane %v1366_v29, 4 }
  0x4e   : > { %v474_v8 = vsel %vm473_vm3, %v472_v1, %v471_v6  ;;  %v629_v16 = vsel %vm467_vm1, %v628_v13, %v627_v14  ;;  %v614_v21 = vrot.slane %v1389_v53, 7  ;;  %v636_v23 = vrot.slane %v1368_v30, 3 }
  0x4f   : > { %v477_v9 = vsel %vm476_vm4, %v475_v3, %v474_v8  ;;  %v631_v19 = vsel %vm470_vm2, %v630_v15, %v629_v16  ;;  %v613_v32 = vsel %vm464_vm0, %v1387_v52, %v612_v18  ;;  %v616_v33 = vrot.slane %v1392_v55, 6 }
  0x50   : > { %v480_v10 = vsel %vm479_vm5, %v478_v5, %v477_v9  ;;  %v633_v22 = vsel %vm473_vm3, %v632_v17, %v631_v19  ;;  %v638_v35 = vrot.slane %v1370_v31, 2  ;;  %v615_v36 = vsel %vm467_vm1, %v614_v21, %v613_v32 }
  0x51   : > { %v483_v11 = vsel %vm482_vm6, %v481_v7, %v480_v10  ;;  %v635_v34 = vsel %vm476_vm4, %v634_v20, %v633_v22  ;;  %v618_v37 = vrot.slane %v1394_v56, 5  ;;  %v617_v39 = vsel %vm470_vm2, %v616_v33, %v615_v36 }
  0x52   : > { %1190 = vmatmul.msk.f32.vlgmr.msra.gmra.mxu0 %vm506_vm7, %v483_v11  ;;  %v637_v38 = vsel %vm479_vm5, %v636_v23, %v635_v34  ;;  %v620_v40 = vrot.slane %v1396_v57, 4  ;;  %v622_v41 = vrot.slane %v1399_v59, 3  ;;  %v624_v44 = vrot.slane %v1401_v60, 2 }
  0x53   : > { %v639_v42 = vsel %vm482_vm6, %v638_v35, %v637_v38  ;;  %v619_v43 = vsel %vm473_vm3, %v618_v37, %v617_v39  ;;  %v874_v50 = vrot.slane %v1356_v24, 3  ;;  %v875_v54 = vrot.slane %v1358_v25, 2  ;;  %v1492_v37 = vld [vmem:[%s395_s26 + $0x4] sm:$0xf]  ;;  %v1494_v38 = vld [vmem:[%s395_s26 + $0x8] sm:$0xf] }
  0x54   : > { %1192 = vmatpush.xpose.msk.msra.mxu2 %vm506_vm7, %v639_v42  ;;  %v621_v45 = vsel %vm476_vm4, %v620_v40, %v619_v43  ;;  %v877_v58 = vrot.slane %v1360_v26, 1  ;;  %v880_v63 = vrot.slane %v1364_v28, 7  ;;  %v860_v0 = vrot.slane %v1385_v51, 3  ;;  %v1497_v40 = vld [vmem:[%s395_s26] sm:$0xf] }
  0x55   : > { %v623_v46 = vsel %vm479_vm5, %v622_v41, %v621_v45  ;;  %v876_v61 = vsel %vm464_vm0, %v875_v54, %v874_v50  ;;  %v861_v1 = vrot.slane %v1387_v52, 2  ;;  %v882_v3 = vrot.slane %v1366_v29, 6  ;;  %v1499_v41 = vld [vmem:[%s395_s26 + $0xc] sm:$0xf]  ;;  %v1501_v42 = vld [vmem:[%s395_s26 + $0x10] sm:$0xf] }
  0x56   : > { %v625_v47 = vsel %vm482_vm6, %v624_v44, %v623_v46  ;;  %v878_v62 = vsel %vm467_vm1, %v877_v58, %v876_v61  ;;  %v863_v4 = vrot.slane %v1389_v53, 1  ;;  %v884_v6 = vrot.slane %v1368_v30, 5  ;;  %v1503_v43 = vld [vmem:[%s395_s26 + $0x14] sm:$0xf]  ;;  %v1505_v44 = vld [vmem:[%s395_s26 + $0x18] sm:$0xf] }
  0x57   : > { %1193 = vmatmul.msk.f32.vlgmr.msra.gmra.mxu2 %vm506_vm7, %v625_v47  ;;  %v879_v2 = vsel %vm470_vm2, %v1362_v27, %v878_v62  ;;  %v862_v7 = vsel %vm464_vm0, %v861_v1, %v860_v0  ;;  %v886_v9 = vrot.slane %v1370_v31, 4  ;;  %v866_v11 = vrot.slane %v1394_v56, 7  ;;  %v1509_v46 = vld [vmem:[%s395_s26 + $0x1c] sm:$0xf] }
  0x58   : > { %v881_v5 = vsel %vm473_vm3, %v880_v63, %v879_v2  ;;  %v864_v10 = vsel %vm467_vm1, %v863_v4, %v862_v7  ;;  %v868_v14 = vrot.slane %v1396_v57, 6  ;;  %v870_v17 = vrot.slane %v1399_v59, 5 }
  0x59   : > { %v883_v8 = vsel %vm476_vm4, %v882_v3, %v881_v5  ;;  %v865_v13 = vsel %vm470_vm2, %v1392_v55, %v864_v10  ;;  %v872_v18 = vrot.slane %v1401_v60, 4  ;;  %v550_v39 = vrot.slane %v1492_v37, 7 }
  0x5a   : > { %v885_v12 = vsel %vm479_vm5, %v884_v6, %v883_v8  ;;  %v867_v16 = vsel %vm473_vm3, %v866_v11, %v865_v13  ;;  %v552_v47 = vrot.slane %v1494_v38, 6  ;;  %v558_v50 = vrot.slane %v1503_v43, 3 }
  0x5b   : > { %v887_v15 = vsel %vm482_vm6, %v886_v9, %v885_v12  ;;  %v869_v19 = vsel %vm476_vm4, %v868_v14, %v867_v16  ;;  %v551_v45 = vsel %vm464_vm0, %v550_v39, %v1497_v40  ;;  %v560_v58 = vrot.slane %v1505_v44, 2 }
  0x5c   : > { %1198 = vmatpush.xpose.msk.msrb.mxu0 %vm506_vm7, %v887_v15  ;;  %v871_v20 = vsel %vm479_vm5, %v870_v17, %v869_v19  ;;  %v553_v54 = vsel %vm467_vm1, %v552_v47, %v551_v45  ;;  %v562_v62 = vrot.slane %v1509_v46, 1  ;;  %v750_v63 = vrot.slane %v1356_v24, 2 }
  0x5d   : > { %v873_v21 = vsel %vm482_vm6, %v872_v18, %v871_v20  ;;  %v751_v0 = vrot.slane %v1358_v25, 1  ;;  %v754_v4 = vrot.slane %v1362_v27, 7  ;;  %v756_v7 = vrot.slane %v1364_v28, 6 }
  0x5e   : > { %v758_v25 = vrot.slane %v1366_v29, 5  ;;  %v760_v9 = vrot.slane %v1368_v30, 4  ;;  %v762_v27 = vrot.slane %v1370_v31, 3  ;;  %v736_v31 = vrot.slane %v1385_v51, 2 }
  0x5f   : > { %1199 = vmatmul.msk.f32.vlgmr.msrb.gmra.mxu0 %vm506_vm7, %v873_v21  ;;  %v752_v3 = vsel %vm464_vm0, %v751_v0, %v750_v63  ;;  %v737_v17 = vrot.slane %v1387_v52, 1  ;;  %v740_v19 = vrot.slane %v1392_v55, 7  ;;  %v675_v45 = vrot.slane %v1497_v40, 1 }
  0x60   : > { %v753_v6 = vsel %vm467_vm1, %v1360_v26, %v752_v3  ;;  %v681_v47 = vrot.slane %v1501_v42, 5  ;;  %vm603_vm8 = vcmask 57344  }
  0x61   : > { %v755_v24 = vsel %vm470_vm2, %v754_v4, %v753_v6  ;;  %v738_v18 = vsel %vm464_vm0, %v737_v17, %v736_v31  ;;  %v933_v31 = vrot.slane %v1505_v44, 5 }
  0x62   : > { %v757_v10 = vsel %vm473_vm3, %v756_v7, %v755_v24  ;;  %v739_v21 = vsel %vm467_vm1, %v1389_v53, %v738_v18  ;;  %v748_v53 = vrot.slane %v1401_v60, 3  ;;  %v676_v60 = vsel %vm464_vm0, %v1492_v37, %v675_v45 }
  0x63   : > { %v759_v12 = vsel %vm476_vm4, %v758_v25, %v757_v10  ;;  %v935_v18 = vrot.slane %v1509_v46, 4 }
  0x64   : > { %v761_v26 = vsel %vm479_vm5, %v760_v9, %v759_v12 }
  0x65   : > { %v763_v28 = vsel %vm482_vm6, %v762_v27, %v761_v26  ;;  %v923_v26 = vrot.slane %v1497_v40, 3 }
  0xcf   : > { %v528_v48 = vpop.f32.mrf.mxu0 }
  0xd0   : > { %v531_v49 = vsel %vm506_vm7, %v528_v48, -inf }
  0xd1   : > { %532 = vmax.xlane.f32.xlu0 %v531_v49  ;;  %v556_v49 = vrot.slane %v1501_v42, 4 }
  0xda   : > { %v661_v22 = vpop.f32.mrf.mxu2 }
  0xdb   : > { %v664_v23 = vsel %vm506_vm7, %v661_v22, -inf }
  0xdc   : > { %665 = vmax.xlane.f32.xlu1 %v664_v23  ;;  %v909_v15 = vpop.f32.mrf.mxu0  ;;  %v741_v23 = vsel %vm470_vm2, %v740_v19, %v739_v21 }
  0xdd   : > { %v912_v29 = vsel %vm506_vm7, %v909_v15, -inf }
  0xde   : > { %913 = vmax.xlane.f32.xlu2 %v912_v29  ;;  %v929_v29 = vrot.slane %v1501_v42, 7 }
 0x144   : > { %v533_v32 = vpop.xlane.xlu0 %532 }
 0x145   : > { %v534_v33 = vsub.f32 %v528_v48, %v533_v32  ;;  %v554_v48 = vrot.slane %v1499_v41, 5  ;;  %v744_v32 = vrot.slane %v1396_v57, 5 }
 0x147   : > { %v535_v34 = vmul.f32 1.442695, %v534_v33  ;;  %v555_v61 = vsel %vm470_vm2, %v554_v48, %v553_v54  ;;  %v683_v48 = vrot.slane %v1503_v43, 4 }
 0x148   : > { %v557_v1 = vsel %vm473_vm3, %v556_v49, %v555_v61 }
 0x149   : > { %1230 = vpow2.f32 %v535_v34  ;;  %v559_v2 = vsel %vm476_vm4, %v558_v50, %v557_v1  ;;  %v746_v34 = vrot.slane %v1399_v59, 4  ;;  %v679_v59 = vrot.slane %v1499_v41, 6 }
 0x14a   : > { %v561_v5 = vsel %vm479_vm5, %v560_v58, %v559_v2  ;;  %v685_v50 = vrot.slane %v1505_v44, 3  ;;  %v687_v58 = vrot.slane %v1509_v46, 2 }
 0x14b   : > { %v563_v8 = vsel %vm482_vm6, %v562_v62, %v561_v5 }
 0x14c   : > { %583 = vmatpush.msra.mxu1 %v563_v8 }
 0x14e   : > { %1195 = vmatpush.xpose.msk.msrb.mxu1 %vm506_vm7, %v763_v28  ;;  %v924_v28 = vrot.slane %v1492_v37, 2 }
 0x14f   : > { %v1487_v35 = vpop.eup %1230  ;;  %v666_v11 = vpop.xlane.xlu1 %665 }
 0x150   : > { %v537_v36 = vsel %vm506_vm7, %v1487_v35, 0.0  ;;  %v667_v13 = vsub.f32 %v661_v22, %v666_v11  ;;  %v742_v22 = vrot.slane %v1394_v56, 6 }
 0x151   : > { %538 = vadd.xlane.f32.xlu0 %v537_v36  ;;  %v914_v57 = vpop.xlane.xlu2 %913 }
 0x152   : > { %v668_v14 = vmul.f32 1.442695, %v667_v13  ;;  %v743_v33 = vsel %vm473_vm3, %v742_v22, %v741_v23  ;;  %v915_v3 = vsub.f32 %v909_v15, %v914_v57  ;;  %v925_v15 = vsel %vm464_vm0, %v924_v28, %v923_v26 }
 0x153   : > { %v745_v55 = vsel %vm476_vm4, %v744_v32, %v743_v33 }
 0x154   : > { %1232 = vpow2.f32 %v668_v14  ;;  %v747_v36 = vsel %vm479_vm5, %v746_v34, %v745_v55  ;;  %v916_v8 = vmul.f32 1.442695, %v915_v3  ;;  %v926_v14 = vrot.slane %v1494_v38, 1 }
 0x155   : > { %v749_v56 = vsel %vm482_vm6, %v748_v53, %v747_v36 }
 0x15a   : > { %v1233_v30 = vpop.eup %1232 }
 0x15b   : > { %v670_v16 = vsel %vm506_vm7, %v1233_v30, 0.0 }
 0x15c   : > { %671 = vadd.xlane.f32.xlu2 %v670_v16  ;;  %v927_v16 = vsel %vm467_vm1, %v926_v14, %v925_v15 }
 0x15d   : > { %v928_v17 = vsel %vm470_vm2, %v1499_v41, %v927_v16 }
 0x15e   : > { %v930_v19 = vsel %vm473_vm3, %v929_v29, %v928_v17 }
 0x1c4   : > { %v539_v20 = vpop.xlane.xlu0 %538 }
 0x1c5   : > { %1234 = vrcp.f32 %v539_v20 }
 0x1cb   : > { %v1235_v51 = vpop.eup %1234 }
 0x1cc   : > { %v541_v52 = vmul.f32 %v1235_v51, %v1487_v35  ;;  %v677_v35 = vrot.slane %v1494_v38, 7 }
 0x1ce   : > { %1191 = vmatmul.msk.f32.vlgmr.msra.gmra.mxu1 %vm506_vm7, %v541_v52  ;;  %v678_v49 = vsel %vm467_vm1, %v677_v35, %v676_v60  ;;  %v799_v60 = vrot.slane %v1497_v40, 2  ;;  %v811_v40 = vrot.slane %v1509_v46, 3 }
 0x1cf   : > { %v672_v39 = vpop.xlane.xlu2 %671  ;;  %v680_v54 = vsel %vm470_vm2, %v679_v59, %v678_v49 }
 0x1d0   : > { %1236 = vrcp.f32 %v672_v39  ;;  %v682_v61 = vsel %vm473_vm3, %v681_v47, %v680_v54  ;;  %v805_v54 = vrot.slane %v1501_v42, 6 }
 0x1d1   : > { %v684_v63 = vsel %vm476_vm4, %v683_v48, %v682_v61  ;;  %1238 = vpow2.f32 %v916_v8  ;;  %v800_v48 = vrot.slane %v1492_v37, 1 }
 0x1d2   : > { %v686_v0 = vsel %vm479_vm5, %v685_v50, %v684_v63  ;;  %v803_v50 = vrot.slane %v1499_v41, 7 }
 0x1d3   : > { %v688_v2 = vsel %vm482_vm6, %v687_v58, %v686_v0  ;;  %v801_v49 = vsel %vm464_vm0, %v800_v48, %v799_v60  ;;  %v807_v58 = vrot.slane %v1503_v43, 5 }
 0x1d4   : > { %708 = vmatpush.msra.mxu3 %v688_v2  ;;  %v802_v61 = vsel %vm467_vm1, %v1494_v38, %v801_v49 }
 0x1d5   : > { %v804_v63 = vsel %vm470_vm2, %v803_v50, %v802_v61 }
 0x1d6   : > { %1196 = vmatmul.msk.f32.vlgmr.msrb.gmra.mxu1 %vm506_vm7, %v749_v56  ;;  %v1237_v62 = vpop.eup %1236  ;;  %v806_v37 = vsel %vm473_vm3, %v805_v54, %v804_v63 }
 0x1d7   : > { %v674_v1 = vmul.f32 %v1237_v62, %v1233_v30  ;;  %v1239_v12 = vpop.eup %1238  ;;  %v931_v30 = vrot.slane %v1503_v43, 6  ;;  %v809_v62 = vrot.slane %v1505_v44, 4  ;;  %v808_v0 = vsel %vm476_vm4, %v807_v58, %v806_v37 }
 0x1d8   : > { %v918_v13 = vsel %vm506_vm7, %v1239_v12, 0.0 }
 0x1d9   : > { %1194 = vmatmul.msk.f32.vlgmr.msra.gmra.mxu3 %vm506_vm7, %v674_v1  ;;  %v932_v20 = vsel %vm476_vm4, %v931_v30, %v930_v19  ;;  %v810_v41 = vsel %vm479_vm5, %v809_v62, %v808_v0 }
 0x1da   : > { %v934_v21 = vsel %vm479_vm5, %v933_v31, %v932_v20  ;;  %v812_v42 = vsel %vm482_vm6, %v811_v40, %v810_v41 }
 0x1db   : > { %v936_v22 = vsel %vm482_vm6, %v935_v18, %v934_v21  ;;  %832 = vmatpush.msrb.mxu3 %v812_v42 }
 0x1dc   : > { %956 = vmatpush.msrb.mxu2 %v936_v22 }
 0x24b   : > { %v585_v4 = vpop.f32.mrf.mxu1 }
 0x24c   : > { %v589_v5 = vrot.slane %v585_v4, 1  ;;  %v590_v6 = vrot.slane %v585_v4, 2  ;;  %v591_v7 = vrot.slane %v585_v4, 3  ;;  %604 = vst.msk [vmem:[%s1576_s27] sm:$0x1] %vm603_vm8, %v585_v4  ;;  %v592_v24 = vrot.slane %v585_v4, 4 }
 0x24d   : > { %v593_v25 = vrot.slane %v585_v4, 5  ;;  %v594_v9 = vrot.slane %v585_v4, 6  ;;  %v595_v10 = vrot.slane %v585_v4, 7 }
 0x24e   : > { %605 = vst.msk [vmem:[%s1576_s27 + $0x4] sm:$0x1] %vm603_vm8, %v589_v5 }
 0x24f   : > { %606 = vst.msk [vmem:[%s1576_s27 + $0x8] sm:$0x1] %vm603_vm8, %v590_v6 }
 0x250   : > { %607 = vst.msk [vmem:[%s1576_s27 + $0xc] sm:$0x1] %vm603_vm8, %v591_v7 }
 0x251   : > { %608 = vst.msk [vmem:[%s1576_s27 + $0x10] sm:$0x1] %vm603_vm8, %v592_v24 }
 0x252   : > { %609 = vst.msk [vmem:[%s1576_s27 + $0x14] sm:$0x1] %vm603_vm8, %v593_v25 }
 0x253   : > { %610 = vst.msk [vmem:[%s1576_s27 + $0x18] sm:$0x1] %vm603_vm8, %v594_v9  ;;  %v785_v27 = vpop.f32.mrf.mxu1 }
 0x254   : > { %611 = vst.msk [vmem:[%s1576_s27 + $0x1c] sm:$0x1] %vm603_vm8, %v595_v10  ;;  %v788_v11 = vsel %vm506_vm7, %v785_v27, -inf }
 0x255   : > { %789 = vmax.xlane.f32.xlu1 %v788_v11 }
 0x25c   : > { %v710_v23 = vpop.f32.mrf.mxu3 }
 0x25d   : > { %919 = vadd.xlane.f32.xlu1 %v918_v13  ;;  %v714_v32 = vrot.slane %v710_v23, 1  ;;  %v715_v33 = vrot.slane %v710_v23, 2  ;;  %v716_v51 = vrot.slane %v710_v23, 3  ;;  %728 = vst.msk [vmem:[%s1576_s27 + $0x1] sm:$0x1] %vm603_vm8, %v710_v23  ;;  %v717_v52 = vrot.slane %v710_v23, 4 }
 0x25e   : > { %v718_v34 = vrot.slane %v710_v23, 5  ;;  %v719_v55 = vrot.slane %v710_v23, 6  ;;  %v720_v53 = vrot.slane %v710_v23, 7 }
 0x25f   : > { %729 = vst.msk [vmem:[%s1576_s27 + $0x5] sm:$0x1] %vm603_vm8, %v714_v32 }
 0x260   : > { %730 = vst.msk [vmem:[%s1576_s27 + $0x9] sm:$0x1] %vm603_vm8, %v715_v33 }
 0x261   : > { %731 = vst.msk [vmem:[%s1576_s27 + $0xd] sm:$0x1] %vm603_vm8, %v716_v51 }
 0x262   : > { %732 = vst.msk [vmem:[%s1576_s27 + $0x11] sm:$0x1] %vm603_vm8, %v717_v52 }
 0x263   : > { %733 = vst.msk [vmem:[%s1576_s27 + $0x15] sm:$0x1] %vm603_vm8, %v718_v34 }
 0x264   : > { %734 = vst.msk [vmem:[%s1576_s27 + $0x19] sm:$0x1] %vm603_vm8, %v719_v55 }
 0x265   : > { %735 = vst.msk [vmem:[%s1576_s27 + $0x1d] sm:$0x1] %vm603_vm8, %v720_v53 }
 0x2c8   : > { %v790_v36 = vpop.xlane.xlu1 %789 }
 0x2c9   : > { %v791_v56 = vsub.f32 %v785_v27, %v790_v36 }
 0x2cb   : > { %v792_v57 = vmul.f32 1.442695, %v791_v56 }
 0x2cd   : > { %1240 = vpow2.f32 %v792_v57 }
 0x2d0   : > { %v920_v39 = vpop.xlane.xlu1 %919 }
 0x2d1   : > { %1242 = vrcp.f32 %v920_v39 }
 0x2d3   : > { %v1241_v45 = vpop.eup %1240 }
 0x2d4   : > { %v794_v35 = vsel %vm506_vm7, %v1241_v45, 0.0 }
 0x2d5   : > { %795 = vadd.xlane.f32.xlu0 %v794_v35 }
 0x2d7   : > { %v1243_v59 = vpop.eup %1242 }
 0x2d8   : > { %v922_v47 = vmul.f32 %v1243_v59, %v1239_v12 }
 0x2da   : > { %1200 = vmatmul.msk.f32.vlgmr.msrb.gmra.mxu2 %vm506_vm7, %v922_v47 }
 0x348   : > { %v796_v43 = vpop.xlane.xlu0 %795 }
 0x349   : > { %1244 = vrcp.f32 %v796_v43 }
 0x34f   : > { %v1245_v38 = vpop.eup %1244 }
 0x350   : > { %v798_v44 = vmul.f32 %v1245_v38, %v1241_v45 }
 0x352   : > { %1197 = vmatmul.msk.f32.vlgmr.msrb.gmra.mxu3 %vm506_vm7, %v798_v44 }
 0x35d   : > { %v958_v46 = vpop.f32.mrf.mxu2 }
 0x35e   : > { %v962_v1 = vrot.slane %v958_v46, 1  ;;  %v963_v2 = vrot.slane %v958_v46, 2  ;;  %v964_v3 = vrot.slane %v958_v46, 3  ;;  %976 = vst.msk [vmem:[%s1576_s27 + $0x3] sm:$0x1] %vm603_vm8, %v958_v46  ;;  %v965_v4 = vrot.slane %v958_v46, 4 }
 0x35f   : > { %v966_v5 = vrot.slane %v958_v46, 5  ;;  %v967_v6 = vrot.slane %v958_v46, 6  ;;  %v968_v7 = vrot.slane %v958_v46, 7 }
 0x360   : > { %977 = vst.msk [vmem:[%s1576_s27 + $0x7] sm:$0x1] %vm603_vm8, %v962_v1 }
 0x361   : > { %978 = vst.msk [vmem:[%s1576_s27 + $0xb] sm:$0x1] %vm603_vm8, %v963_v2 }
 0x362   : > { %979 = vst.msk [vmem:[%s1576_s27 + $0xf] sm:$0x1] %vm603_vm8, %v964_v3 }
 0x363   : > { %980 = vst.msk [vmem:[%s1576_s27 + $0x13] sm:$0x1] %vm603_vm8, %v965_v4 }
 0x364   : > { %981 = vst.msk [vmem:[%s1576_s27 + $0x17] sm:$0x1] %vm603_vm8, %v966_v5 }
 0x365   : > { %982 = vst.msk [vmem:[%s1576_s27 + $0x1b] sm:$0x1] %vm603_vm8, %v967_v6 }
 0x366   : > { %983 = vst.msk [vmem:[%s1576_s27 + $0x1f] sm:$0x1] %vm603_vm8, %v968_v7 }
 0x3d5   : > { %v834_v8 = vpop.f32.mrf.mxu3 }
 0x3d6   : > { %v838_v24 = vrot.slane %v834_v8, 1  ;;  %v839_v25 = vrot.slane %v834_v8, 2  ;;  %v840_v9 = vrot.slane %v834_v8, 3  ;;  %852 = vst.msk [vmem:[%s1576_s27 + $0x2] sm:$0x1] %vm603_vm8, %v834_v8  ;;  %v841_v10 = vrot.slane %v834_v8, 4 }
 0x3d7   : > { %v842_v27 = vrot.slane %v834_v8, 5  ;;  %v843_v11 = vrot.slane %v834_v8, 6  ;;  %v844_v12 = vrot.slane %v834_v8, 7 }
 0x3d8   : > { %853 = vst.msk [vmem:[%s1576_s27 + $0x6] sm:$0x1] %vm603_vm8, %v838_v24 }
 0x3d9   : > { %854 = vst.msk [vmem:[%s1576_s27 + $0xa] sm:$0x1] %vm603_vm8, %v839_v25 }
 0x3da   : > { %855 = vst.msk [vmem:[%s1576_s27 + $0xe] sm:$0x1] %vm603_vm8, %v840_v9  ;;  %990 = sbr.rel (!%p1324_p5) target bundleno = 999 (0x3e7), region = 159 }
 0x3db   : > { %856 = vst.msk [vmem:[%s1576_s27 + $0x12] sm:$0x1] %vm603_vm8, %v841_v10 }
 0x3dc   : > { %857 = vst.msk [vmem:[%s1576_s27 + $0x16] sm:$0x1] %vm603_vm8, %v842_v27 }
 0x3dd   : > { %858 = vst.msk [vmem:[%s1576_s27 + $0x1a] sm:$0x1] %vm603_vm8, %v843_v11  ;;  %v1009_v13 = vld [vmem:[%s1576_s27] sm:$0xf] (%p1324_p5) }
 0x3de   : > { %859 = vst.msk [vmem:[%s1576_s27 + $0x1e] sm:$0x1] %vm603_vm8, %v844_v12 }
 0x3df   : > { %v1011_v26 = vld [vmem:[%s1576_s27 + $0x4] sm:$0xf]  ;;  %1010 = vst [vmem:[%s992_s4] sm:$0xf] %v1009_v13 }
 0x3e0   : > { %v1013_v28 = vld [vmem:[%s1576_s27 + $0x8] sm:$0xf]  ;;  %1012 = vst [vmem:[%s992_s4 + $0x8] sm:$0xf] %v1011_v26 }
 0x3e1   : > { %v1015_v14 = vld [vmem:[%s1576_s27 + $0xc] sm:$0xf]  ;;  %1014 = vst [vmem:[%s992_s4 + $0x10] sm:$0xf] %v1013_v28 }
 0x3e2   : > { %v1017_v15 = vld [vmem:[%s1576_s27 + $0x10] sm:$0xf]  ;;  %1016 = vst [vmem:[%s992_s4 + $0x18] sm:$0xf] %v1015_v14 }
 0x3e3   : > { %v1019_v29 = vld [vmem:[%s1576_s27 + $0x14] sm:$0xf]  ;;  %1018 = vst [vmem:[%s992_s4 + $0x20] sm:$0xf] %v1017_v15 }
 0x3e4   : > { %v1021_v30 = vld [vmem:[%s1576_s27 + $0x18] sm:$0xf]  ;;  %1020 = vst [vmem:[%s992_s4 + $0x28] sm:$0xf] %v1019_v29 }
 0x3e5   : > { %v1023_v16 = vld [vmem:[%s1576_s27 + $0x1c] sm:$0xf]  ;;  %1022 = vst [vmem:[%s992_s4 + $0x30] sm:$0xf] %v1021_v30 }
 0x3e6   : > { %1024 = vst [vmem:[%s992_s4 + $0x38] sm:$0xf] %v1023_v16 }
 0x3e7 PF: > { %p10_p10 = scmp.ge.s32.totalorder %s1307_s16, 4   ;;  %s1708_s12 = smov %s1264_s13 }
 0x3e8   : > { %s1709_s13 = smov %s1318_s19  ;;  %s1710_s14 = smov %s1307_s16 }
 0x3e9   :  { %12 = sbr.rel (!%p10_p10) target bundleno = 2 (0x2), region = 247 }

</bundles_post_ra>
